<compile_context>
chip_gen: v7x
topology: tpu7x:2x2x1
jax: 0.10.0
libtpu: 0.0.40
codegen_flags: <defaults>
</compile_context>

<pallas_src>
import math
import functools

import jax
import jax.numpy as jnp
from jax.experimental import pallas as pl
from jax.experimental.pallas import tpu as pltpu

LANE = 128      # TPU lane width: hidden/output feature dims padded to this
SUBLANE = 8     # TPU sublane width: batch tiles are multiples of this


def _round_up(n, m):
    return ((n + m - 1) // m) * m


def _choose_batch_tile(B):
    """Batch tile (multiple of 8, <=128) giving >=2 grid steps when possible
    (so v7x's two TensorCores both get tiles) with small row-padding waste."""
    B8 = _round_up(B, SUBLANE)
    if B8 <= SUBLANE:
        return B8, B8
    n_tiles = max(2, -(-B8 // 128))
    tb = _round_up(-(-B8 // n_tiles), SUBLANE)
    b_pad = _round_up(B8, tb)
    return tb, b_pad


# -----------------------------------------------------------------------------
# Pallas kernel (one batch tile per grid step; all params VMEM-resident)
# -----------------------------------------------------------------------------
def _make_kernel(hidden_dim, t_dim):
    eps = 1e-5                     # torch.nn.LayerNorm default
    half = t_dim // 2              # NOTE: assumes even t_dim (same as reference)

    def kernel(time_ref, x_ref, state_ref, freqs_ref,
               # state_mlp: Linear, LN, Linear, LN, Linear
               sw1, sb1, sg1, sB1, sw2, sb2, sg2, sB2, sw3, sb3,
               # time_mlp: Linear, Linear (sinusoidal emb computed in-kernel)
               tw1, tb1, tw2, tb2,
               # action_layer: Linear
               aw, ab,
               # mid_layer: Linear (pre-split into 3 K blocks), LN, Linear, LN, Linear
               mw1a, mw1b, mw1c, mb1, mg1, mB1,
               mw2, mb2, mg2, mB2, mw3, mb3,
               out_ref):

        f32 = jnp.float32
        bf16 = jnp.bfloat16

        def dot(a, w_ref):
            # bf16 MXU operands, f32 accumulation; surrounding math stays f32.
            return jnp.dot(a.astype(bf16), w_ref[...], preferred_element_type=f32)

        def small_proj(a, w_ref, b_ref):
            # Tiny true input dim (4 / 8): unrolled VPU outer-product accumulate.
            # Avoids unaligned-K MXU ops and wrapper-side feature padding.
            w = w_ref[...]                                     # (K, Np) f32
            acc = jnp.zeros((a.shape[0], w.shape[-1]), f32) + b_ref[...]
            for j in range(a.shape[-1]):                       # static unroll
                acc = acc + a[:, j:j + 1] * w[j:j + 1, :]
            return acc

        # Lane masks for masked-variance LayerNorm — built once, reused.
        Hp = sb1.shape[-1]
        H2p = mb1.shape[-1]
        mask_h = jax.lax.broadcasted_iota(jnp.int32, (1, Hp), 1) < hidden_dim
        mask_2h = jax.lax.broadcasted_iota(jnp.int32, (1, H2p), 1) < 2 * hidden_dim
        inv_h = 1.0 / hidden_dim
        inv_2h = 1.0 / (2 * hidden_dim)

        def layer_norm(h, g_ref, b_ref, mask, inv_n):
            # Padded lanes of `h` are exactly zero (zero-padded weights/biases),
            # so the unmasked lane-sum equals the true-lane sum; variance masks
            # padded lanes so stats match the unpadded LayerNorm.
            mu = jnp.sum(h, axis=-1, keepdims=True) * inv_n
            d = jnp.where(mask, h - mu, 0.0)
            var = jnp.sum(d * d, axis=-1, keepdims=True) * inv_n
            return (h - mu) * jax.lax.rsqrt(var + eps) * g_ref[...] + b_ref[...]

        relu = lambda h: jnp.maximum(h, 0.0)

        # ---- state_mlp ------------------------------------------------------
        h = relu(layer_norm(small_proj(state_ref[...], sw1, sb1),
                            sg1, sB1, mask_h, inv_h))
        h = relu(layer_norm(dot(h, sw2) + sb2[...], sg2, sB2, mask_h, inv_h))
        processed_state = dot(h, sw3) + sb3[...]                    # (TB, Hp)

        # ---- time_mlp (sinusoidal embedding in-kernel) ----------------------
        # Built at the padded lane width; lanes >= t_dim hold cos(0)=1 garbage
        # that is annihilated by tw1's zero-padded K rows.
        t = time_ref[...]                                           # (TB, 1)
        arg = t * freqs_ref[...]                                    # (TB, Tp)
        lane_t = jax.lax.broadcasted_iota(jnp.int32, (1, freqs_ref.shape[-1]), 1)
        emb = jnp.where(lane_t < half, jnp.sin(arg), jnp.cos(arg))
        ht = relu(dot(emb, tw1) + tb1[...])
        processed_time = dot(ht, tw2) + tb2[...]                    # (TB, Hp)

        # ---- action_layer ---------------------------------------------------
        processed_action = relu(small_proj(x_ref[...], aw, ab))     # (TB, Hp)

        # ---- mid_layer ------------------------------------------------------
        # torch.cat([action, time, state], 1) @ W1 == a@W1a + t@W1b + s@W1c
        m = (dot(processed_action, mw1a)
             + dot(processed_time, mw1b)
             + dot(processed_state, mw1c)
             + mb1[...])
        m = relu(layer_norm(m, mg1, mB1, mask_2h, inv_2h))
        m = relu(layer_norm(dot(m, mw2) + mb2[...], mg2, mB2, mask_h, inv_h))
        out = dot(m, mw3) + mb3[...]                                # (TB, out_pad)

        out_ref[...] = out.astype(out_ref.dtype)

    return kernel


# -----------------------------------------------------------------------------
# Parameter construction (deterministic, torch-Linear-like scaling)
# -----------------------------------------------------------------------------
def init_params(key, state_dim, action_dim, hidden_dim, t_dim):
    def linear(k, fan_in, fan_out):
        kw, kb = jax.random.split(k)
        bound = 1.0 / math.sqrt(fan_in)
        w = jax.random.uniform(kw, (fan_in, fan_out), jnp.float32, -bound, bound)
        b = jax.random.uniform(kb, (1, fan_out), jnp.float32, -bound, bound)
        return w, b

    def ln(dim):
        return jnp.ones((1, dim), jnp.float32), jnp.zeros((1, dim), jnp.float32)

    keys = jax.random.split(key, 10)
    H, T = hidden_dim, t_dim

    sw1, sb1 = linear(keys[0], state_dim, H); sg1, sB1 = ln(H)
    sw2, sb2 = linear(keys[1], H, H);         sg2, sB2 = ln(H)
    sw3, sb3 = linear(keys[2], H, H)

    tw1, tb1 = linear(keys[3], T, 2 * T)
    tw2, tb2 = linear(keys[4], 2 * T, H)

    aw, ab = linear(keys[5], action_dim, H)

    mw1, mb1 = linear(keys[6], 3 * H, 2 * H); mg1, mB1 = ln(2 * H)
    mw2, mb2 = linear(keys[7], 2 * H, H);     mg2, mB2 = ln(H)
    mw3, mb3 = linear(keys[8], H, action_dim)

    return (
        sw1, sb1, sg1, sB1, sw2, sb2, sg2, sB2, sw3, sb3,
        tw1, tb1, tw2, tb2,
        aw, ab,
        mw1, mb1, mg1, mB1, mw2, mb2, mg2, mB2, mw3, mb3,
    )


def pad_params(params, hidden_dim):
    """Zero-pad feature dims to 128-lane multiples, store MXU weights in bf16,
    keep the tiny VPU-path first-layer weights (sw1, aw) and all bias/LN vectors
    in f32, and split the mid-layer concat-Linear into three K blocks."""
    (sw1, sb1, sg1, sB1, sw2, sb2, sg2, sB2, sw3, sb3,
     tw1, tb1, tw2, tb2, aw, ab,
     mw1, mb1, mg1, mB1, mw2, mb2, mg2, mB2, mw3, mb3) = params
    H = hidden_dim

    def pw(w, pad_k=True, dtype=jnp.bfloat16):   # pad weight (K, N)
        k_pad = _round_up(w.shape[0], LANE) - w.shape[0] if pad_k else 0
        n_pad = _round_up(w.shape[1], LANE) - w.shape[1]
        return jnp.pad(w, ((0, k_pad), (0, n_pad))).astype(dtype)

    def pv(v):                                   # pad row vector (1, F), f32
        return jnp.pad(v, ((0, 0), (0, _round_up(v.shape[1], LANE) - v.shape[1])))

    # Split the 3H contraction of the concat-Linear into three H-row blocks.
    mw1a, mw1b, mw1c = mw1[0:H], mw1[H:2 * H], mw1[2 * H:3 * H]

    return (
        pw(sw1, pad_k=False, dtype=jnp.float32), pv(sb1), pv(sg1), pv(sB1),
        pw(sw2), pv(sb2), pv(sg2), pv(sB2),
        pw(sw3), pv(sb3),
        pw(tw1), pv(tb1),                        # tw1 K padded to Tp (emb lanes)
        pw(tw2), pv(tb2),
        pw(aw, pad_k=False, dtype=jnp.float32), pv(ab),
        pw(mw1a), pw(mw1b), pw(mw1c), pv(mb1), pv(mg1), pv(mB1),
        pw(mw2), pv(mb2), pv(mg2), pv(mB2),
        pw(mw3), pv(mb3),
    )


def sinusoidal_pos_emb(time, t_dim):
    half_dim = t_dim // 2
    emb_scale = math.log(10000.0) / max(half_dim - 1, 1)
    freqs = jnp.exp(-emb_scale * jnp.arange(half_dim, dtype=jnp.float32))
    args = time.astype(jnp.float32)[:, None] * freqs[None, :]
    return jnp.concatenate([jnp.sin(args), jnp.cos(args)], axis=-1)


# -----------------------------------------------------------------------------
# Wrapper
# -----------------------------------------------------------------------------
@functools.partial(jax.jit, static_argnames=("action_dim", "hidden_dim", "t_dim"))
def mlp_forward(x, time, state, padded_params, *, action_dim, hidden_dim, t_dim):
    B = x.shape[0]
    TB, B_pad = _choose_batch_tile(B)

    # Only the batch dim is padded; x/state/time keep their true last dims.
    x_p = jnp.pad(x.astype(jnp.float32), ((0, B_pad - B), (0, 0)))
    s_p = jnp.pad(state.astype(jnp.float32), ((0, B_pad - B), (0, 0)))
    t_p = jnp.pad(time.astype(jnp.float32).reshape(B, 1), ((0, B_pad - B), (0, 0)))

    # Loop-invariant sinusoidal frequencies (constant-folded; never recomputed
    # per grid step), duplicated for the sin/cos halves and lane-padded.
    half = t_dim // 2
    emb_scale = math.log(10000.0) / max(half - 1, 1)
    base = jnp.exp(-emb_scale * jnp.arange(half, dtype=jnp.float32))
    Tp = _round_up(t_dim, LANE)
    freqs = jnp.pad(jnp.concatenate([base, base]), (0, Tp - t_dim)).reshape(1, Tp)

    out_pad = _round_up(action_dim, LANE)

    acts = (t_p, x_p, s_p)
    act_specs = [pl.BlockSpec((TB, a.shape[1]), lambda i: (i, 0)) for a in acts]
    # Constant-index full blocks: parameters stay VMEM-resident across tiles.
    const_specs = [pl.BlockSpec(p.shape, lambda i: (0, 0))
                   for p in (freqs,) + tuple(padded_params)]

    # VMEM budget: resident params + per-tile activations (with headroom).
    param_bytes = sum(int(p.size) * p.dtype.itemsize for p in padded_params) \
        + int(freqs.size) * 4
    act_bytes = sum(TB * a.shape[1] * 4 for a in acts) + TB * out_pad * 4
    vmem_limit = int(min(100 * 1024 * 1024,
                         max(32 * 1024 * 1024,
                             2 * param_bytes + 8 * act_bytes + (4 << 20))))

    # Advisory cost estimate for XLA's scheduler.
    matmul_weights = [p for p in padded_params if p.ndim == 2 and p.shape[0] > 1]
    flops = 2 * B_pad * sum(int(w.shape[0]) * int(w.shape[1]) for w in matmul_weights)
    bytes_accessed = int(sum(int(a.size) * 4 for a in acts) + param_bytes
                         + B_pad * out_pad * 4)
    transcendentals = int(B_pad * (t_dim + 4))

    out = pl.pallas_call(
        _make_kernel(hidden_dim, t_dim),
        out_shape=jax.ShapeDtypeStruct((B_pad, out_pad), jnp.float32),
        grid=(B_pad // TB,),
        in_specs=act_specs + const_specs,
        out_specs=pl.BlockSpec((TB, out_pad), lambda i: (i, 0)),
        compiler_params=pltpu.CompilerParams(
            dimension_semantics=("parallel",),     # batch tiles -> megacore on v7x
            vmem_limit_bytes=vmem_limit,
        ),
        cost_estimate=pl.CostEstimate(
            flops=flops,
            transcendentals=transcendentals,
            bytes_accessed=bytes_accessed,
        ),
    )(*acts, freqs, *padded_params)

    return out[:B, :action_dim]


# -----------------------------------------------------------------------------
# Pure-JAX reference (unpadded, f32) for correctness check
# -----------------------------------------------------------------------------
def mlp_reference(x, time, state, params, t_dim):
    (sw1, sb1, sg1, sB1, sw2, sb2, sg2, sB2, sw3, sb3,
     tw1, tb1, tw2, tb2, aw, ab,
     mw1, mb1, mg1, mB1, mw2, mb2, mg2, mB2, mw3, mb3) = params

    def ln(h, g, b):
        mu = jnp.mean(h, axis=-1, keepdims=True)
        var = jnp.mean((h - mu) ** 2, axis=-1, keepdims=True)
        return (h - mu) / jnp.sqrt(var + 1e-5) * g + b

    relu = lambda h: jnp.maximum(h, 0.0)

    h = relu(ln(state @ sw1 + sb1, sg1, sB1))
    h = relu(ln(h @ sw2 + sb2, sg2, sB2))
    ps = h @ sw3 + sb3

    temb = sinusoidal_pos_emb(time, t_dim)
    pt = relu(temb @ tw1 + tb1) @ tw2 + tb2

    pa = relu(x @ aw + ab)

    combined = jnp.concatenate([pa, pt, ps], axis=1)
    m = relu(ln(combined @ mw1 + mb1, mg1, mB1))
    m = relu(ln(m @ mw2 + mb2, mg2, mB2))
    return m @ mw3 + mb3


# -----------------------------------------------------------------------------
if __name__ == "__main__":
    STATE_DIM = 8
    ACTION_DIM = 4
    HIDDEN_DIM = 32
    T_DIM = 16
    BATCH = 2

    key = jax.random.PRNGKey(0)
    k_params, k_x, k_state, k_time = jax.random.split(key, 4)

    params = init_params(k_params, STATE_DIM, ACTION_DIM, HIDDEN_DIM, T_DIM)
    padded = pad_params(params, HIDDEN_DIM)

    x = jax.random.normal(k_x, (BATCH, ACTION_DIM), dtype=jnp.float32)
    state = jax.random.normal(k_state, (BATCH, STATE_DIM), dtype=jnp.float32)
    time = jax.random.randint(k_time, (BATCH,), 0, 1000).astype(jnp.float32)

    out = mlp_forward(x, time, state, padded,
                      action_dim=ACTION_DIM, hidden_dim=HIDDEN_DIM, t_dim=T_DIM)
    out = jax.block_until_ready(out)

    ref = mlp_reference(x, time, state, params, T_DIM)
    assert out.shape == (BATCH, ACTION_DIM)
    # bf16 MXU operands with f32 accumulation -> loose-but-meaningful tolerance
    # vs the full-f32 reference (structural bugs produce O(0.5+) errors).
    assert jnp.allclose(out, ref, atol=5e-2, rtol=5e-2), "mismatch vs JAX reference"

    print("KERNEL_OK")
</pallas_src>

<mosaic_0001>
module attributes {stable_mosaic.version = 11 : i64} {
  func.func @kernel(%arg0: i32, %arg1: memref<8x1xf32, #tpu.memory_space<vmem>>, %arg2: memref<8x4xf32, #tpu.memory_space<vmem>>, %arg3: memref<8x8xf32, #tpu.memory_space<vmem>>, %arg4: memref<1x128xf32, #tpu.memory_space<vmem>>, %arg5: memref<8x128xf32, #tpu.memory_space<vmem>>, %arg6: memref<1x128xf32, #tpu.memory_space<vmem>>, %arg7: memref<1x128xf32, #tpu.memory_space<vmem>>, %arg8: memref<1x128xf32, #tpu.memory_space<vmem>>, %arg9: memref<128x128xbf16, #tpu.memory_space<vmem>>, %arg10: memref<1x128xf32, #tpu.memory_space<vmem>>, %arg11: memref<1x128xf32, #tpu.memory_space<vmem>>, %arg12: memref<1x128xf32, #tpu.memory_space<vmem>>, %arg13: memref<128x128xbf16, #tpu.memory_space<vmem>>, %arg14: memref<1x128xf32, #tpu.memory_space<vmem>>, %arg15: memref<128x128xbf16, #tpu.memory_space<vmem>>, %arg16: memref<1x128xf32, #tpu.memory_space<vmem>>, %arg17: memref<128x128xbf16, #tpu.memory_space<vmem>>, %arg18: memref<1x128xf32, #tpu.memory_space<vmem>>, %arg19: memref<4x128xf32, #tpu.memory_space<vmem>>, %arg20: memref<1x128xf32, #tpu.memory_space<vmem>>, %arg21: memref<128x128xbf16, #tpu.memory_space<vmem>>, %arg22: memref<128x128xbf16, #tpu.memory_space<vmem>>, %arg23: memref<128x128xbf16, #tpu.memory_space<vmem>>, %arg24: memref<1x128xf32, #tpu.memory_space<vmem>>, %arg25: memref<1x128xf32, #tpu.memory_space<vmem>>, %arg26: memref<1x128xf32, #tpu.memory_space<vmem>>, %arg27: memref<128x128xbf16, #tpu.memory_space<vmem>>, %arg28: memref<1x128xf32, #tpu.memory_space<vmem>>, %arg29: memref<1x128xf32, #tpu.memory_space<vmem>>, %arg30: memref<1x128xf32, #tpu.memory_space<vmem>>, %arg31: memref<128x128xbf16, #tpu.memory_space<vmem>>, %arg32: memref<1x128xf32, #tpu.memory_space<vmem>>, %arg33: memref<8x128xf32, #tpu.memory_space<vmem>>) attributes {dimension_semantics = [#tpu.dimension_semantics<parallel>], iteration_bounds = array<i64: 1>, scalar_prefetch = 0 : i64, scratch_operands = 0 : i64, tpu.core_type = #tpu.core_type<tc>, window_params = [{transform_indices = @transform_0, window_bounds = array<i64: 8, 1>}, {transform_indices = @transform_1, window_bounds = array<i64: 8, 4>}, {transform_indices = @transform_2, window_bounds = array<i64: 8, 8>}, {pipeline_mode = #tpu.pipeline_mode<synchronous>, transform_indices = @transform_3, window_bounds = array<i64: 1, 128>}, {pipeline_mode = #tpu.pipeline_mode<synchronous>, transform_indices = @transform_4, window_bounds = array<i64: 8, 128>}, {pipeline_mode = #tpu.pipeline_mode<synchronous>, transform_indices = @transform_5, window_bounds = array<i64: 1, 128>}, {pipeline_mode = #tpu.pipeline_mode<synchronous>, transform_indices = @transform_6, window_bounds = array<i64: 1, 128>}, {pipeline_mode = #tpu.pipeline_mode<synchronous>, transform_indices = @transform_7, window_bounds = array<i64: 1, 128>}, {pipeline_mode = #tpu.pipeline_mode<synchronous>, transform_indices = @transform_8, window_bounds = array<i64: 128, 128>}, {pipeline_mode = #tpu.pipeline_mode<synchronous>, transform_indices = @transform_9, window_bounds = array<i64: 1, 128>}, {pipeline_mode = #tpu.pipeline_mode<synchronous>, transform_indices = @transform_10, window_bounds = array<i64: 1, 128>}, {pipeline_mode = #tpu.pipeline_mode<synchronous>, transform_indices = @transform_11, window_bounds = array<i64: 1, 128>}, {pipeline_mode = #tpu.pipeline_mode<synchronous>, transform_indices = @transform_12, window_bounds = array<i64: 128, 128>}, {pipeline_mode = #tpu.pipeline_mode<synchronous>, transform_indices = @transform_13, window_bounds = array<i64: 1, 128>}, {pipeline_mode = #tpu.pipeline_mode<synchronous>, transform_indices = @transform_14, window_bounds = array<i64: 128, 128>}, {pipeline_mode = #tpu.pipeline_mode<synchronous>, transform_indices = @transform_15, window_bounds = array<i64: 1, 128>}, {pipeline_mode = #tpu.pipeline_mode<synchronous>, transform_indices = @transform_16, window_bounds = array<i64: 128, 128>}, {pipeline_mode = #tpu.pipeline_mode<synchronous>, transform_indices = @transform_17, window_bounds = array<i64: 1, 128>}, {pipeline_mode = #tpu.pipeline_mode<synchronous>, transform_indices = @transform_18, window_bounds = array<i64: 4, 128>}, {pipeline_mode = #tpu.pipeline_mode<synchronous>, transform_indices = @transform_19, window_bounds = array<i64: 1, 128>}, {pipeline_mode = #tpu.pipeline_mode<synchronous>, transform_indices = @transform_20, window_bounds = array<i64: 128, 128>}, {pipeline_mode = #tpu.pipeline_mode<synchronous>, transform_indices = @transform_21, window_bounds = array<i64: 128, 128>}, {pipeline_mode = #tpu.pipeline_mode<synchronous>, transform_indices = @transform_22, window_bounds = array<i64: 128, 128>}, {pipeline_mode = #tpu.pipeline_mode<synchronous>, transform_indices = @transform_23, window_bounds = array<i64: 1, 128>}, {pipeline_mode = #tpu.pipeline_mode<synchronous>, transform_indices = @transform_24, window_bounds = array<i64: 1, 128>}, {pipeline_mode = #tpu.pipeline_mode<synchronous>, transform_indices = @transform_25, window_bounds = array<i64: 1, 128>}, {pipeline_mode = #tpu.pipeline_mode<synchronous>, transform_indices = @transform_26, window_bounds = array<i64: 128, 128>}, {pipeline_mode = #tpu.pipeline_mode<synchronous>, transform_indices = @transform_27, window_bounds = array<i64: 1, 128>}, {pipeline_mode = #tpu.pipeline_mode<synchronous>, transform_indices = @transform_28, window_bounds = array<i64: 1, 128>}, {pipeline_mode = #tpu.pipeline_mode<synchronous>, transform_indices = @transform_29, window_bounds = array<i64: 1, 128>}, {pipeline_mode = #tpu.pipeline_mode<synchronous>, transform_indices = @transform_30, window_bounds = array<i64: 128, 128>}, {pipeline_mode = #tpu.pipeline_mode<synchronous>, transform_indices = @transform_31, window_bounds = array<i64: 1, 128>}, {transform_indices = @transform_32, window_bounds = array<i64: 8, 128>}]} {
    %0 = tpu.iota {dimensions = array<i32: 1>} : vector<1x128xi32>
    %c32_i32 = arith.constant 32 : i32
    %1 = vector.broadcast %c32_i32 : i32 to vector<1x128xi32>
    %2 = arith.cmpi slt, %0, %1 : vector<1x128xi32>
    %3 = tpu.iota {dimensions = array<i32: 1>} : vector<1x128xi32>
    %c64_i32 = arith.constant 64 : i32
    %4 = vector.broadcast %c64_i32 : i32 to vector<1x128xi32>
    %5 = arith.cmpi slt, %3, %4 : vector<1x128xi32>
    %c0 = arith.constant 0 : index
    %c0_0 = arith.constant 0 : index
    %6 = vector.load %arg3[%c0, %c0_0] : memref<8x8xf32, #tpu.memory_space<vmem>>, vector<8x8xf32>
    %c0_1 = arith.constant 0 : index
    %c0_2 = arith.constant 0 : index
    %7 = vector.load %arg5[%c0_1, %c0_2] : memref<8x128xf32, #tpu.memory_space<vmem>>, vector<8x128xf32>
    %cst = arith.constant 0.000000e+00 : f32
    %8 = vector.broadcast %cst : f32 to vector<8x128xf32>
    %c0_3 = arith.constant 0 : index
    %c0_4 = arith.constant 0 : index
    %9 = vector.load %arg6[%c0_3, %c0_4] : memref<1x128xf32, #tpu.memory_space<vmem>>, vector<1x128xf32>
    %10 = vector.broadcast %9 : vector<1x128xf32> to vector<8x128xf32>
    %11 = arith.addf %8, %10 : vector<8x128xf32>
    %12 = vector.extract_strided_slice %6 {offsets = [0, 0], sizes = [8, 1], strides = [1, 1]} : vector<8x8xf32> to vector<8x1xf32>
    %13 = vector.extract_strided_slice %7 {offsets = [0, 0], sizes = [1, 128], strides = [1, 1]} : vector<8x128xf32> to vector<1x128xf32>
    %14 = vector.broadcast %12 : vector<8x1xf32> to vector<8x128xf32>
    %15 = vector.broadcast %13 : vector<1x128xf32> to vector<8x128xf32>
    %16 = arith.mulf %14, %15 : vector<8x128xf32>
    %17 = arith.addf %11, %16 : vector<8x128xf32>
    %18 = vector.extract_strided_slice %6 {offsets = [0, 1], sizes = [8, 1], strides = [1, 1]} : vector<8x8xf32> to vector<8x1xf32>
    %19 = vector.extract_strided_slice %7 {offsets = [1, 0], sizes = [1, 128], strides = [1, 1]} : vector<8x128xf32> to vector<1x128xf32>
    %20 = vector.broadcast %18 : vector<8x1xf32> to vector<8x128xf32>
    %21 = vector.broadcast %19 : vector<1x128xf32> to vector<8x128xf32>
    %22 = arith.mulf %20, %21 : vector<8x128xf32>
    %23 = arith.addf %17, %22 : vector<8x128xf32>
    %24 = vector.extract_strided_slice %6 {offsets = [0, 2], sizes = [8, 1], strides = [1, 1]} : vector<8x8xf32> to vector<8x1xf32>
    %25 = vector.extract_strided_slice %7 {offsets = [2, 0], sizes = [1, 128], strides = [1, 1]} : vector<8x128xf32> to vector<1x128xf32>
    %26 = vector.broadcast %24 : vector<8x1xf32> to vector<8x128xf32>
    %27 = vector.broadcast %25 : vector<1x128xf32> to vector<8x128xf32>
    %28 = arith.mulf %26, %27 : vector<8x128xf32>
    %29 = arith.addf %23, %28 : vector<8x128xf32>
    %30 = vector.extract_strided_slice %6 {offsets = [0, 3], sizes = [8, 1], strides = [1, 1]} : vector<8x8xf32> to vector<8x1xf32>
    %31 = vector.extract_strided_slice %7 {offsets = [3, 0], sizes = [1, 128], strides = [1, 1]} : vector<8x128xf32> to vector<1x128xf32>
    %32 = vector.broadcast %30 : vector<8x1xf32> to vector<8x128xf32>
    %33 = vector.broadcast %31 : vector<1x128xf32> to vector<8x128xf32>
    %34 = arith.mulf %32, %33 : vector<8x128xf32>
    %35 = arith.addf %29, %34 : vector<8x128xf32>
    %36 = vector.extract_strided_slice %6 {offsets = [0, 4], sizes = [8, 1], strides = [1, 1]} : vector<8x8xf32> to vector<8x1xf32>
    %37 = vector.extract_strided_slice %7 {offsets = [4, 0], sizes = [1, 128], strides = [1, 1]} : vector<8x128xf32> to vector<1x128xf32>
    %38 = vector.broadcast %36 : vector<8x1xf32> to vector<8x128xf32>
    %39 = vector.broadcast %37 : vector<1x128xf32> to vector<8x128xf32>
    %40 = arith.mulf %38, %39 : vector<8x128xf32>
    %41 = arith.addf %35, %40 : vector<8x128xf32>
    %42 = vector.extract_strided_slice %6 {offsets = [0, 5], sizes = [8, 1], strides = [1, 1]} : vector<8x8xf32> to vector<8x1xf32>
    %43 = vector.extract_strided_slice %7 {offsets = [5, 0], sizes = [1, 128], strides = [1, 1]} : vector<8x128xf32> to vector<1x128xf32>
    %44 = vector.broadcast %42 : vector<8x1xf32> to vector<8x128xf32>
    %45 = vector.broadcast %43 : vector<1x128xf32> to vector<8x128xf32>
    %46 = arith.mulf %44, %45 : vector<8x128xf32>
    %47 = arith.addf %41, %46 : vector<8x128xf32>
    %48 = vector.extract_strided_slice %6 {offsets = [0, 6], sizes = [8, 1], strides = [1, 1]} : vector<8x8xf32> to vector<8x1xf32>
    %49 = vector.extract_strided_slice %7 {offsets = [6, 0], sizes = [1, 128], strides = [1, 1]} : vector<8x128xf32> to vector<1x128xf32>
    %50 = vector.broadcast %48 : vector<8x1xf32> to vector<8x128xf32>
    %51 = vector.broadcast %49 : vector<1x128xf32> to vector<8x128xf32>
    %52 = arith.mulf %50, %51 : vector<8x128xf32>
    %53 = arith.addf %47, %52 : vector<8x128xf32>
    %54 = vector.extract_strided_slice %6 {offsets = [0, 7], sizes = [8, 1], strides = [1, 1]} : vector<8x8xf32> to vector<8x1xf32>
    %55 = vector.extract_strided_slice %7 {offsets = [7, 0], sizes = [1, 128], strides = [1, 1]} : vector<8x128xf32> to vector<1x128xf32>
    %56 = vector.broadcast %54 : vector<8x1xf32> to vector<8x128xf32>
    %57 = vector.broadcast %55 : vector<1x128xf32> to vector<8x128xf32>
    %58 = arith.mulf %56, %57 : vector<8x128xf32>
    %59 = arith.addf %53, %58 : vector<8x128xf32>
    %cst_5 = arith.constant dense<0.000000e+00> : vector<8xf32>
    %60 = vector.multi_reduction <add>, %59, %cst_5 [1] : vector<8x128xf32> to vector<8xf32>
    %61 = vector.shape_cast %60 : vector<8xf32> to vector<8x1xf32>
    %cst_6 = arith.constant 3.125000e-02 : f32
    %62 = vector.broadcast %cst_6 : f32 to vector<8x1xf32>
    %63 = arith.mulf %61, %62 : vector<8x1xf32>
    %64 = vector.broadcast %63 : vector<8x1xf32> to vector<8x128xf32>
    %65 = arith.subf %59, %64 : vector<8x128xf32>
    %cst_7 = arith.constant 0.000000e+00 : f32
    %66 = vector.shape_cast %2 : vector<1x128xi1> to vector<1x128xi1>
    %67 = vector.broadcast %66 : vector<1x128xi1> to vector<8x128xi1>
    %68 = vector.broadcast %cst_7 : f32 to vector<8x128xf32>
    %69 = arith.select %67, %65, %68 : vector<8x128xi1>, vector<8x128xf32>
    %70 = arith.mulf %69, %69 : vector<8x128xf32>
    %cst_8 = arith.constant dense<0.000000e+00> : vector<8xf32>
    %71 = vector.multi_reduction <add>, %70, %cst_8 [1] : vector<8x128xf32> to vector<8xf32>
    %72 = vector.shape_cast %71 : vector<8xf32> to vector<8x1xf32>
    %cst_9 = arith.constant 3.125000e-02 : f32
    %73 = vector.broadcast %cst_9 : f32 to vector<8x1xf32>
    %74 = arith.mulf %72, %73 : vector<8x1xf32>
    %75 = vector.broadcast %63 : vector<8x1xf32> to vector<8x128xf32>
    %76 = arith.subf %59, %75 : vector<8x128xf32>
    %cst_10 = arith.constant 9.99999974E-6 : f32
    %77 = vector.broadcast %cst_10 : f32 to vector<8x1xf32>
    %78 = arith.addf %74, %77 : vector<8x1xf32>
    %79 = math.rsqrt %78 : vector<8x1xf32>
    %80 = vector.broadcast %79 : vector<8x1xf32> to vector<8x128xf32>
    %81 = arith.mulf %76, %80 : vector<8x128xf32>
    %c0_11 = arith.constant 0 : index
    %c0_12 = arith.constant 0 : index
    %82 = vector.load %arg7[%c0_11, %c0_12] : memref<1x128xf32, #tpu.memory_space<vmem>>, vector<1x128xf32>
    %83 = vector.broadcast %82 : vector<1x128xf32> to vector<8x128xf32>
    %84 = arith.mulf %81, %83 : vector<8x128xf32>
    %c0_13 = arith.constant 0 : index
    %c0_14 = arith.constant 0 : index
    %85 = vector.load %arg8[%c0_13, %c0_14] : memref<1x128xf32, #tpu.memory_space<vmem>>, vector<1x128xf32>
    %86 = vector.broadcast %85 : vector<1x128xf32> to vector<8x128xf32>
    %87 = arith.addf %84, %86 : vector<8x128xf32>
    %cst_15 = arith.constant 0.000000e+00 : f32
    %88 = vector.broadcast %cst_15 : f32 to vector<8x128xf32>
    %89 = arith.maximumf %87, %88 : vector<8x128xf32>
    %90 = arith.truncf %89 : vector<8x128xf32> to vector<8x128xbf16>
    %c0_16 = arith.constant 0 : index
    %c0_17 = arith.constant 0 : index
    %91 = vector.load %arg9[%c0_16, %c0_17] : memref<128x128xbf16, #tpu.memory_space<vmem>>, vector<128x128xbf16>
    %cst_18 = arith.constant dense<0.000000e+00> : vector<8x128xf32>
    %92 = tpu.matmul %90, %91, %cst_18 {dimension_numbers = #tpu.dot_dimension_numbers<[1], [0], [0], [1], [0, 0, 1, 1], [], []>} : vector<8x128xbf16>, vector<128x128xbf16>, vector<8x128xf32> -> vector<8x128xf32>
    %c0_19 = arith.constant 0 : index
    %c0_20 = arith.constant 0 : index
    %93 = vector.load %arg10[%c0_19, %c0_20] : memref<1x128xf32, #tpu.memory_space<vmem>>, vector<1x128xf32>
    %94 = vector.broadcast %93 : vector<1x128xf32> to vector<8x128xf32>
    %95 = arith.addf %92, %94 : vector<8x128xf32>
    %cst_21 = arith.constant dense<0.000000e+00> : vector<8xf32>
    %96 = vector.multi_reduction <add>, %95, %cst_21 [1] : vector<8x128xf32> to vector<8xf32>
    %97 = vector.shape_cast %96 : vector<8xf32> to vector<8x1xf32>
    %cst_22 = arith.constant 3.125000e-02 : f32
    %98 = vector.broadcast %cst_22 : f32 to vector<8x1xf32>
    %99 = arith.mulf %97, %98 : vector<8x1xf32>
    %100 = vector.broadcast %99 : vector<8x1xf32> to vector<8x128xf32>
    %101 = arith.subf %95, %100 : vector<8x128xf32>
    %cst_23 = arith.constant 0.000000e+00 : f32
    %102 = vector.shape_cast %2 : vector<1x128xi1> to vector<1x128xi1>
    %103 = vector.broadcast %102 : vector<1x128xi1> to vector<8x128xi1>
    %104 = vector.broadcast %cst_23 : f32 to vector<8x128xf32>
    %105 = arith.select %103, %101, %104 : vector<8x128xi1>, vector<8x128xf32>
    %106 = arith.mulf %105, %105 : vector<8x128xf32>
    %cst_24 = arith.constant dense<0.000000e+00> : vector<8xf32>
    %107 = vector.multi_reduction <add>, %106, %cst_24 [1] : vector<8x128xf32> to vector<8xf32>
    %108 = vector.shape_cast %107 : vector<8xf32> to vector<8x1xf32>
    %cst_25 = arith.constant 3.125000e-02 : f32
    %109 = vector.broadcast %cst_25 : f32 to vector<8x1xf32>
    %110 = arith.mulf %108, %109 : vector<8x1xf32>
    %111 = vector.broadcast %99 : vector<8x1xf32> to vector<8x128xf32>
    %112 = arith.subf %95, %111 : vector<8x128xf32>
    %cst_26 = arith.constant 9.99999974E-6 : f32
    %113 = vector.broadcast %cst_26 : f32 to vector<8x1xf32>
    %114 = arith.addf %110, %113 : vector<8x1xf32>
    %115 = math.rsqrt %114 : vector<8x1xf32>
    %116 = vector.broadcast %115 : vector<8x1xf32> to vector<8x128xf32>
    %117 = arith.mulf %112, %116 : vector<8x128xf32>
    %c0_27 = arith.constant 0 : index
    %c0_28 = arith.constant 0 : index
    %118 = vector.load %arg11[%c0_27, %c0_28] : memref<1x128xf32, #tpu.memory_space<vmem>>, vector<1x128xf32>
    %119 = vector.broadcast %118 : vector<1x128xf32> to vector<8x128xf32>
    %120 = arith.mulf %117, %119 : vector<8x128xf32>
    %c0_29 = arith.constant 0 : index
    %c0_30 = arith.constant 0 : index
    %121 = vector.load %arg12[%c0_29, %c0_30] : memref<1x128xf32, #tpu.memory_space<vmem>>, vector<1x128xf32>
    %122 = vector.broadcast %121 : vector<1x128xf32> to vector<8x128xf32>
    %123 = arith.addf %120, %122 : vector<8x128xf32>
    %cst_31 = arith.constant 0.000000e+00 : f32
    %124 = vector.broadcast %cst_31 : f32 to vector<8x128xf32>
    %125 = arith.maximumf %123, %124 : vector<8x128xf32>
    %126 = arith.truncf %125 : vector<8x128xf32> to vector<8x128xbf16>
    %c0_32 = arith.constant 0 : index
    %c0_33 = arith.constant 0 : index
    %127 = vector.load %arg13[%c0_32, %c0_33] : memref<128x128xbf16, #tpu.memory_space<vmem>>, vector<128x128xbf16>
    %cst_34 = arith.constant dense<0.000000e+00> : vector<8x128xf32>
    %128 = tpu.matmul %126, %127, %cst_34 {dimension_numbers = #tpu.dot_dimension_numbers<[1], [0], [0], [1], [0, 0, 1, 1], [], []>} : vector<8x128xbf16>, vector<128x128xbf16>, vector<8x128xf32> -> vector<8x128xf32>
    %c0_35 = arith.constant 0 : index
    %c0_36 = arith.constant 0 : index
    %129 = vector.load %arg14[%c0_35, %c0_36] : memref<1x128xf32, #tpu.memory_space<vmem>>, vector<1x128xf32>
    %130 = vector.broadcast %129 : vector<1x128xf32> to vector<8x128xf32>
    %131 = arith.addf %128, %130 : vector<8x128xf32>
    %c0_37 = arith.constant 0 : index
    %c0_38 = arith.constant 0 : index
    %132 = vector.load %arg1[%c0_37, %c0_38] : memref<8x1xf32, #tpu.memory_space<vmem>>, vector<8x1xf32>
    %c0_39 = arith.constant 0 : index
    %c0_40 = arith.constant 0 : index
    %133 = vector.load %arg4[%c0_39, %c0_40] : memref<1x128xf32, #tpu.memory_space<vmem>>, vector<1x128xf32>
    %134 = vector.broadcast %132 : vector<8x1xf32> to vector<8x128xf32>
    %135 = vector.broadcast %133 : vector<1x128xf32> to vector<8x128xf32>
    %136 = arith.mulf %134, %135 : vector<8x128xf32>
    %137 = tpu.iota {dimensions = array<i32: 1>} : vector<1x128xi32>
    %c8_i32 = arith.constant 8 : i32
    %138 = vector.broadcast %c8_i32 : i32 to vector<1x128xi32>
    %139 = arith.cmpi slt, %137, %138 : vector<1x128xi32>
    %140 = math.sin %136 : vector<8x128xf32>
    %141 = math.cos %136 : vector<8x128xf32>
    %142 = vector.shape_cast %139 : vector<1x128xi1> to vector<1x128xi1>
    %143 = vector.broadcast %142 : vector<1x128xi1> to vector<8x128xi1>
    %144 = arith.select %143, %140, %141 : vector<8x128xi1>, vector<8x128xf32>
    %145 = arith.truncf %144 : vector<8x128xf32> to vector<8x128xbf16>
    %c0_41 = arith.constant 0 : index
    %c0_42 = arith.constant 0 : index
    %146 = vector.load %arg15[%c0_41, %c0_42] : memref<128x128xbf16, #tpu.memory_space<vmem>>, vector<128x128xbf16>
    %cst_43 = arith.constant dense<0.000000e+00> : vector<8x128xf32>
    %147 = tpu.matmul %145, %146, %cst_43 {dimension_numbers = #tpu.dot_dimension_numbers<[1], [0], [0], [1], [0, 0, 1, 1], [], []>} : vector<8x128xbf16>, vector<128x128xbf16>, vector<8x128xf32> -> vector<8x128xf32>
    %c0_44 = arith.constant 0 : index
    %c0_45 = arith.constant 0 : index
    %148 = vector.load %arg16[%c0_44, %c0_45] : memref<1x128xf32, #tpu.memory_space<vmem>>, vector<1x128xf32>
    %149 = vector.broadcast %148 : vector<1x128xf32> to vector<8x128xf32>
    %150 = arith.addf %147, %149 : vector<8x128xf32>
    %cst_46 = arith.constant 0.000000e+00 : f32
    %151 = vector.broadcast %cst_46 : f32 to vector<8x128xf32>
    %152 = arith.maximumf %150, %151 : vector<8x128xf32>
    %153 = arith.truncf %152 : vector<8x128xf32> to vector<8x128xbf16>
    %c0_47 = arith.constant 0 : index
    %c0_48 = arith.constant 0 : index
    %154 = vector.load %arg17[%c0_47, %c0_48] : memref<128x128xbf16, #tpu.memory_space<vmem>>, vector<128x128xbf16>
    %cst_49 = arith.constant dense<0.000000e+00> : vector<8x128xf32>
    %155 = tpu.matmul %153, %154, %cst_49 {dimension_numbers = #tpu.dot_dimension_numbers<[1], [0], [0], [1], [0, 0, 1, 1], [], []>} : vector<8x128xbf16>, vector<128x128xbf16>, vector<8x128xf32> -> vector<8x128xf32>
    %c0_50 = arith.constant 0 : index
    %c0_51 = arith.constant 0 : index
    %156 = vector.load %arg18[%c0_50, %c0_51] : memref<1x128xf32, #tpu.memory_space<vmem>>, vector<1x128xf32>
    %157 = vector.broadcast %156 : vector<1x128xf32> to vector<8x128xf32>
    %158 = arith.addf %155, %157 : vector<8x128xf32>
    %c0_52 = arith.constant 0 : index
    %c0_53 = arith.constant 0 : index
    %159 = vector.load %arg2[%c0_52, %c0_53] : memref<8x4xf32, #tpu.memory_space<vmem>>, vector<8x4xf32>
    %c0_54 = arith.constant 0 : index
    %c0_55 = arith.constant 0 : index
    %160 = vector.load %arg19[%c0_54, %c0_55] : memref<4x128xf32, #tpu.memory_space<vmem>>, vector<4x128xf32>
    %cst_56 = arith.constant 0.000000e+00 : f32
    %161 = vector.broadcast %cst_56 : f32 to vector<8x128xf32>
    %c0_57 = arith.constant 0 : index
    %c0_58 = arith.constant 0 : index
    %162 = vector.load %arg20[%c0_57, %c0_58] : memref<1x128xf32, #tpu.memory_space<vmem>>, vector<1x128xf32>
    %163 = vector.broadcast %162 : vector<1x128xf32> to vector<8x128xf32>
    %164 = arith.addf %161, %163 : vector<8x128xf32>
    %165 = vector.extract_strided_slice %159 {offsets = [0, 0], sizes = [8, 1], strides = [1, 1]} : vector<8x4xf32> to vector<8x1xf32>
    %166 = vector.extract_strided_slice %160 {offsets = [0, 0], sizes = [1, 128], strides = [1, 1]} : vector<4x128xf32> to vector<1x128xf32>
    %167 = vector.broadcast %165 : vector<8x1xf32> to vector<8x128xf32>
    %168 = vector.broadcast %166 : vector<1x128xf32> to vector<8x128xf32>
    %169 = arith.mulf %167, %168 : vector<8x128xf32>
    %170 = arith.addf %164, %169 : vector<8x128xf32>
    %171 = vector.extract_strided_slice %159 {offsets = [0, 1], sizes = [8, 1], strides = [1, 1]} : vector<8x4xf32> to vector<8x1xf32>
    %172 = vector.extract_strided_slice %160 {offsets = [1, 0], sizes = [1, 128], strides = [1, 1]} : vector<4x128xf32> to vector<1x128xf32>
    %173 = vector.broadcast %171 : vector<8x1xf32> to vector<8x128xf32>
    %174 = vector.broadcast %172 : vector<1x128xf32> to vector<8x128xf32>
    %175 = arith.mulf %173, %174 : vector<8x128xf32>
    %176 = arith.addf %170, %175 : vector<8x128xf32>
    %177 = vector.extract_strided_slice %159 {offsets = [0, 2], sizes = [8, 1], strides = [1, 1]} : vector<8x4xf32> to vector<8x1xf32>
    %178 = vector.extract_strided_slice %160 {offsets = [2, 0], sizes = [1, 128], strides = [1, 1]} : vector<4x128xf32> to vector<1x128xf32>
    %179 = vector.broadcast %177 : vector<8x1xf32> to vector<8x128xf32>
    %180 = vector.broadcast %178 : vector<1x128xf32> to vector<8x128xf32>
    %181 = arith.mulf %179, %180 : vector<8x128xf32>
    %182 = arith.addf %176, %181 : vector<8x128xf32>
    %183 = vector.extract_strided_slice %159 {offsets = [0, 3], sizes = [8, 1], strides = [1, 1]} : vector<8x4xf32> to vector<8x1xf32>
    %184 = vector.extract_strided_slice %160 {offsets = [3, 0], sizes = [1, 128], strides = [1, 1]} : vector<4x128xf32> to vector<1x128xf32>
    %185 = vector.broadcast %183 : vector<8x1xf32> to vector<8x128xf32>
    %186 = vector.broadcast %184 : vector<1x128xf32> to vector<8x128xf32>
    %187 = arith.mulf %185, %186 : vector<8x128xf32>
    %188 = arith.addf %182, %187 : vector<8x128xf32>
    %cst_59 = arith.constant 0.000000e+00 : f32
    %189 = vector.broadcast %cst_59 : f32 to vector<8x128xf32>
    %190 = arith.maximumf %188, %189 : vector<8x128xf32>
    %191 = arith.truncf %190 : vector<8x128xf32> to vector<8x128xbf16>
    %c0_60 = arith.constant 0 : index
    %c0_61 = arith.constant 0 : index
    %192 = vector.load %arg21[%c0_60, %c0_61] : memref<128x128xbf16, #tpu.memory_space<vmem>>, vector<128x128xbf16>
    %cst_62 = arith.constant dense<0.000000e+00> : vector<8x128xf32>
    %193 = tpu.matmul %191, %192, %cst_62 {dimension_numbers = #tpu.dot_dimension_numbers<[1], [0], [0], [1], [0, 0, 1, 1], [], []>} : vector<8x128xbf16>, vector<128x128xbf16>, vector<8x128xf32> -> vector<8x128xf32>
    %194 = arith.truncf %158 : vector<8x128xf32> to vector<8x128xbf16>
    %c0_63 = arith.constant 0 : index
    %c0_64 = arith.constant 0 : index
    %195 = vector.load %arg22[%c0_63, %c0_64] : memref<128x128xbf16, #tpu.memory_space<vmem>>, vector<128x128xbf16>
    %cst_65 = arith.constant dense<0.000000e+00> : vector<8x128xf32>
    %196 = tpu.matmul %194, %195, %cst_65 {dimension_numbers = #tpu.dot_dimension_numbers<[1], [0], [0], [1], [0, 0, 1, 1], [], []>} : vector<8x128xbf16>, vector<128x128xbf16>, vector<8x128xf32> -> vector<8x128xf32>
    %197 = arith.addf %193, %196 : vector<8x128xf32>
    %198 = arith.truncf %131 : vector<8x128xf32> to vector<8x128xbf16>
    %c0_66 = arith.constant 0 : index
    %c0_67 = arith.constant 0 : index
    %199 = vector.load %arg23[%c0_66, %c0_67] : memref<128x128xbf16, #tpu.memory_space<vmem>>, vector<128x128xbf16>
    %cst_68 = arith.constant dense<0.000000e+00> : vector<8x128xf32>
    %200 = tpu.matmul %198, %199, %cst_68 {dimension_numbers = #tpu.dot_dimension_numbers<[1], [0], [0], [1], [0, 0, 1, 1], [], []>} : vector<8x128xbf16>, vector<128x128xbf16>, vector<8x128xf32> -> vector<8x128xf32>
    %201 = arith.addf %197, %200 : vector<8x128xf32>
    %c0_69 = arith.constant 0 : index
    %c0_70 = arith.constant 0 : index
    %202 = vector.load %arg24[%c0_69, %c0_70] : memref<1x128xf32, #tpu.memory_space<vmem>>, vector<1x128xf32>
    %203 = vector.broadcast %202 : vector<1x128xf32> to vector<8x128xf32>
    %204 = arith.addf %201, %203 : vector<8x128xf32>
    %cst_71 = arith.constant dense<0.000000e+00> : vector<8xf32>
    %205 = vector.multi_reduction <add>, %204, %cst_71 [1] : vector<8x128xf32> to vector<8xf32>
    %206 = vector.shape_cast %205 : vector<8xf32> to vector<8x1xf32>
    %cst_72 = arith.constant 1.562500e-02 : f32
    %207 = vector.broadcast %cst_72 : f32 to vector<8x1xf32>
    %208 = arith.mulf %206, %207 : vector<8x1xf32>
    %209 = vector.broadcast %208 : vector<8x1xf32> to vector<8x128xf32>
    %210 = arith.subf %204, %209 : vector<8x128xf32>
    %cst_73 = arith.constant 0.000000e+00 : f32
    %211 = vector.shape_cast %5 : vector<1x128xi1> to vector<1x128xi1>
    %212 = vector.broadcast %211 : vector<1x128xi1> to vector<8x128xi1>
    %213 = vector.broadcast %cst_73 : f32 to vector<8x128xf32>
    %214 = arith.select %212, %210, %213 : vector<8x128xi1>, vector<8x128xf32>
    %215 = arith.mulf %214, %214 : vector<8x128xf32>
    %cst_74 = arith.constant dense<0.000000e+00> : vector<8xf32>
    %216 = vector.multi_reduction <add>, %215, %cst_74 [1] : vector<8x128xf32> to vector<8xf32>
    %217 = vector.shape_cast %216 : vector<8xf32> to vector<8x1xf32>
    %cst_75 = arith.constant 1.562500e-02 : f32
    %218 = vector.broadcast %cst_75 : f32 to vector<8x1xf32>
    %219 = arith.mulf %217, %218 : vector<8x1xf32>
    %220 = vector.broadcast %208 : vector<8x1xf32> to vector<8x128xf32>
    %221 = arith.subf %204, %220 : vector<8x128xf32>
    %cst_76 = arith.constant 9.99999974E-6 : f32
    %222 = vector.broadcast %cst_76 : f32 to vector<8x1xf32>
    %223 = arith.addf %219, %222 : vector<8x1xf32>
    %224 = math.rsqrt %223 : vector<8x1xf32>
    %225 = vector.broadcast %224 : vector<8x1xf32> to vector<8x128xf32>
    %226 = arith.mulf %221, %225 : vector<8x128xf32>
    %c0_77 = arith.constant 0 : index
    %c0_78 = arith.constant 0 : index
    %227 = vector.load %arg25[%c0_77, %c0_78] : memref<1x128xf32, #tpu.memory_space<vmem>>, vector<1x128xf32>
    %228 = vector.broadcast %227 : vector<1x128xf32> to vector<8x128xf32>
    %229 = arith.mulf %226, %228 : vector<8x128xf32>
    %c0_79 = arith.constant 0 : index
    %c0_80 = arith.constant 0 : index
    %230 = vector.load %arg26[%c0_79, %c0_80] : memref<1x128xf32, #tpu.memory_space<vmem>>, vector<1x128xf32>
    %231 = vector.broadcast %230 : vector<1x128xf32> to vector<8x128xf32>
    %232 = arith.addf %229, %231 : vector<8x128xf32>
    %cst_81 = arith.constant 0.000000e+00 : f32
    %233 = vector.broadcast %cst_81 : f32 to vector<8x128xf32>
    %234 = arith.maximumf %232, %233 : vector<8x128xf32>
    %235 = arith.truncf %234 : vector<8x128xf32> to vector<8x128xbf16>
    %c0_82 = arith.constant 0 : index
    %c0_83 = arith.constant 0 : index
    %236 = vector.load %arg27[%c0_82, %c0_83] : memref<128x128xbf16, #tpu.memory_space<vmem>>, vector<128x128xbf16>
    %cst_84 = arith.constant dense<0.000000e+00> : vector<8x128xf32>
    %237 = tpu.matmul %235, %236, %cst_84 {dimension_numbers = #tpu.dot_dimension_numbers<[1], [0], [0], [1], [0, 0, 1, 1], [], []>} : vector<8x128xbf16>, vector<128x128xbf16>, vector<8x128xf32> -> vector<8x128xf32>
    %c0_85 = arith.constant 0 : index
    %c0_86 = arith.constant 0 : index
    %238 = vector.load %arg28[%c0_85, %c0_86] : memref<1x128xf32, #tpu.memory_space<vmem>>, vector<1x128xf32>
    %239 = vector.broadcast %238 : vector<1x128xf32> to vector<8x128xf32>
    %240 = arith.addf %237, %239 : vector<8x128xf32>
    %cst_87 = arith.constant dense<0.000000e+00> : vector<8xf32>
    %241 = vector.multi_reduction <add>, %240, %cst_87 [1] : vector<8x128xf32> to vector<8xf32>
    %242 = vector.shape_cast %241 : vector<8xf32> to vector<8x1xf32>
    %cst_88 = arith.constant 3.125000e-02 : f32
    %243 = vector.broadcast %cst_88 : f32 to vector<8x1xf32>
    %244 = arith.mulf %242, %243 : vector<8x1xf32>
    %245 = vector.broadcast %244 : vector<8x1xf32> to vector<8x128xf32>
    %246 = arith.subf %240, %245 : vector<8x128xf32>
    %cst_89 = arith.constant 0.000000e+00 : f32
    %247 = vector.shape_cast %2 : vector<1x128xi1> to vector<1x128xi1>
    %248 = vector.broadcast %247 : vector<1x128xi1> to vector<8x128xi1>
    %249 = vector.broadcast %cst_89 : f32 to vector<8x128xf32>
    %250 = arith.select %248, %246, %249 : vector<8x128xi1>, vector<8x128xf32>
    %251 = arith.mulf %250, %250 : vector<8x128xf32>
    %cst_90 = arith.constant dense<0.000000e+00> : vector<8xf32>
    %252 = vector.multi_reduction <add>, %251, %cst_90 [1] : vector<8x128xf32> to vector<8xf32>
    %253 = vector.shape_cast %252 : vector<8xf32> to vector<8x1xf32>
    %cst_91 = arith.constant 3.125000e-02 : f32
    %254 = vector.broadcast %cst_91 : f32 to vector<8x1xf32>
    %255 = arith.mulf %253, %254 : vector<8x1xf32>
    %256 = vector.broadcast %244 : vector<8x1xf32> to vector<8x128xf32>
    %257 = arith.subf %240, %256 : vector<8x128xf32>
    %cst_92 = arith.constant 9.99999974E-6 : f32
    %258 = vector.broadcast %cst_92 : f32 to vector<8x1xf32>
    %259 = arith.addf %255, %258 : vector<8x1xf32>
    %260 = math.rsqrt %259 : vector<8x1xf32>
    %261 = vector.broadcast %260 : vector<8x1xf32> to vector<8x128xf32>
    %262 = arith.mulf %257, %261 : vector<8x128xf32>
    %c0_93 = arith.constant 0 : index
    %c0_94 = arith.constant 0 : index
    %263 = vector.load %arg29[%c0_93, %c0_94] : memref<1x128xf32, #tpu.memory_space<vmem>>, vector<1x128xf32>
    %264 = vector.broadcast %263 : vector<1x128xf32> to vector<8x128xf32>
    %265 = arith.mulf %262, %264 : vector<8x128xf32>
    %c0_95 = arith.constant 0 : index
    %c0_96 = arith.constant 0 : index
    %266 = vector.load %arg30[%c0_95, %c0_96] : memref<1x128xf32, #tpu.memory_space<vmem>>, vector<1x128xf32>
    %267 = vector.broadcast %266 : vector<1x128xf32> to vector<8x128xf32>
    %268 = arith.addf %265, %267 : vector<8x128xf32>
    %cst_97 = arith.constant 0.000000e+00 : f32
    %269 = vector.broadcast %cst_97 : f32 to vector<8x128xf32>
    %270 = arith.maximumf %268, %269 : vector<8x128xf32>
    %271 = arith.truncf %270 : vector<8x128xf32> to vector<8x128xbf16>
    %c0_98 = arith.constant 0 : index
    %c0_99 = arith.constant 0 : index
    %272 = vector.load %arg31[%c0_98, %c0_99] : memref<128x128xbf16, #tpu.memory_space<vmem>>, vector<128x128xbf16>
    %cst_100 = arith.constant dense<0.000000e+00> : vector<8x128xf32>
    %273 = tpu.matmul %271, %272, %cst_100 {dimension_numbers = #tpu.dot_dimension_numbers<[1], [0], [0], [1], [0, 0, 1, 1], [], []>} : vector<8x128xbf16>, vector<128x128xbf16>, vector<8x128xf32> -> vector<8x128xf32>
    %c0_101 = arith.constant 0 : index
    %c0_102 = arith.constant 0 : index
    %274 = vector.load %arg32[%c0_101, %c0_102] : memref<1x128xf32, #tpu.memory_space<vmem>>, vector<1x128xf32>
    %275 = vector.broadcast %274 : vector<1x128xf32> to vector<8x128xf32>
    %276 = arith.addf %273, %275 : vector<8x128xf32>
    %c0_103 = arith.constant 0 : index
    %c0_104 = arith.constant 0 : index
    %277 = vector.load %arg33[%c0_103, %c0_104] : memref<8x128xf32, #tpu.memory_space<vmem>>, vector<8x128xf32>
    tpu.vector_store %arg33[%c0_103, %c0_104], %276 {strides = array<i32>} : memref<8x128xf32, #tpu.memory_space<vmem>>, vector<8x128xf32>,
    return
  }
  func.func @transform_0(%arg0: i32) -> (i32, i32) {
    %c0_i32 = arith.constant 0 : i32
    %c0_i32_0 = arith.constant 0 : i32
    return %arg0, %c0_i32 : i32, i32
  }
  func.func @transform_1(%arg0: i32) -> (i32, i32) {
    %c0_i32 = arith.constant 0 : i32
    %c0_i32_0 = arith.constant 0 : i32
    return %arg0, %c0_i32 : i32, i32
  }
  func.func @transform_2(%arg0: i32) -> (i32, i32) {
    %c0_i32 = arith.constant 0 : i32
    %c0_i32_0 = arith.constant 0 : i32
    return %arg0, %c0_i32 : i32, i32
  }
  func.func @transform_3(%arg0: i32) -> (i32, i32) {
    %c0_i32 = arith.constant 0 : i32
    %c0_i32_0 = arith.constant 0 : i32
    %c0_i32_1 = arith.constant 0 : i32
    return %c0_i32, %c0_i32_0 : i32, i32
  }
  func.func @transform_4(%arg0: i32) -> (i32, i32) {
    %c0_i32 = arith.constant 0 : i32
    %c0_i32_0 = arith.constant 0 : i32
    %c0_i32_1 = arith.constant 0 : i32
    return %c0_i32, %c0_i32_0 : i32, i32
  }
  func.func @transform_5(%arg0: i32) -> (i32, i32) {
    %c0_i32 = arith.constant 0 : i32
    %c0_i32_0 = arith.constant 0 : i32
    %c0_i32_1 = arith.constant 0 : i32
    return %c0_i32, %c0_i32_0 : i32, i32
  }
  func.func @transform_6(%arg0: i32) -> (i32, i32) {
    %c0_i32 = arith.constant 0 : i32
    %c0_i32_0 = arith.constant 0 : i32
    %c0_i32_1 = arith.constant 0 : i32
    return %c0_i32, %c0_i32_0 : i32, i32
  }
  func.func @transform_7(%arg0: i32) -> (i32, i32) {
    %c0_i32 = arith.constant 0 : i32
    %c0_i32_0 = arith.constant 0 : i32
    %c0_i32_1 = arith.constant 0 : i32
    return %c0_i32, %c0_i32_0 : i32, i32
  }
  func.func @transform_8(%arg0: i32) -> (i32, i32) {
    %c0_i32 = arith.constant 0 : i32
    %c0_i32_0 = arith.constant 0 : i32
    %c0_i32_1 = arith.constant 0 : i32
    return %c0_i32, %c0_i32_0 : i32, i32
  }
  func.func @transform_9(%arg0: i32) -> (i32, i32) {
    %c0_i32 = arith.constant 0 : i32
    %c0_i32_0 = arith.constant 0 : i32
    %c0_i32_1 = arith.constant 0 : i32
    return %c0_i32, %c0_i32_0 : i32, i32
  }
  func.func @transform_10(%arg0: i32) -> (i32, i32) {
    %c0_i32 = arith.constant 0 : i32
    %c0_i32_0 = arith.constant 0 : i32
    %c0_i32_1 = arith.constant 0 : i32
    return %c0_i32, %c0_i32_0 : i32, i32
  }
  func.func @transform_11(%arg0: i32) -> (i32, i32) {
    %c0_i32 = arith.constant 0 : i32
    %c0_i32_0 = arith.constant 0 : i32
    %c0_i32_1 = arith.constant 0 : i32
    return %c0_i32, %c0_i32_0 : i32, i32
  }
  func.func @transform_12(%arg0: i32) -> (i32, i32) {
    %c0_i32 = arith.constant 0 : i32
    %c0_i32_0 = arith.constant 0 : i32
    %c0_i32_1 = arith.constant 0 : i32
    return %c0_i32, %c0_i32_0 : i32, i32
  }
  func.func @transform_13(%arg0: i32) -> (i32, i32) {
    %c0_i32 = arith.constant 0 : i32
    %c0_i32_0 = arith.constant 0 : i32
    %c0_i32_1 = arith.constant 0 : i32
    return %c0_i32, %c0_i32_0 : i32, i32
  }
  func.func @transform_14(%arg0: i32) -> (i32, i32) {
    %c0_i32 = arith.constant 0 : i32
    %c0_i32_0 = arith.constant 0 : i32
    %c0_i32_1 = arith.constant 0 : i32
    return %c0_i32, %c0_i32_0 : i32, i32
  }
  func.func @transform_15(%arg0: i32) -> (i32, i32) {
    %c0_i32 = arith.constant 0 : i32
    %c0_i32_0 = arith.constant 0 : i32
    %c0_i32_1 = arith.constant 0 : i32
    return %c0_i32, %c0_i32_0 : i32, i32
  }
  func.func @transform_16(%arg0: i32) -> (i32, i32) {
    %c0_i32 = arith.constant 0 : i32
    %c0_i32_0 = arith.constant 0 : i32
    %c0_i32_1 = arith.constant 0 : i32
    return %c0_i32, %c0_i32_0 : i32, i32
  }
  func.func @transform_17(%arg0: i32) -> (i32, i32) {
    %c0_i32 = arith.constant 0 : i32
    %c0_i32_0 = arith.constant 0 : i32
    %c0_i32_1 = arith.constant 0 : i32
    return %c0_i32, %c0_i32_0 : i32, i32
  }
  func.func @transform_18(%arg0: i32) -> (i32, i32) {
    %c0_i32 = arith.constant 0 : i32
    %c0_i32_0 = arith.constant 0 : i32
    %c0_i32_1 = arith.constant 0 : i32
    return %c0_i32, %c0_i32_0 : i32, i32
  }
  func.func @transform_19(%arg0: i32) -> (i32, i32) {
    %c0_i32 = arith.constant 0 : i32
    %c0_i32_0 = arith.constant 0 : i32
    %c0_i32_1 = arith.constant 0 : i32
    return %c0_i32, %c0_i32_0 : i32, i32
  }
  func.func @transform_20(%arg0: i32) -> (i32, i32) {
    %c0_i32 = arith.constant 0 : i32
    %c0_i32_0 = arith.constant 0 : i32
    %c0_i32_1 = arith.constant 0 : i32
    return %c0_i32, %c0_i32_0 : i32, i32
  }
  func.func @transform_21(%arg0: i32) -> (i32, i32) {
    %c0_i32 = arith.constant 0 : i32
    %c0_i32_0 = arith.constant 0 : i32
    %c0_i32_1 = arith.constant 0 : i32
    return %c0_i32, %c0_i32_0 : i32, i32
  }
  func.func @transform_22(%arg0: i32) -> (i32, i32) {
    %c0_i32 = arith.constant 0 : i32
    %c0_i32_0 = arith.constant 0 : i32
    %c0_i32_1 = arith.constant 0 : i32
    return %c0_i32, %c0_i32_0 : i32, i32
  }
  func.func @transform_23(%arg0: i32) -> (i32, i32) {
    %c0_i32 = arith.constant 0 : i32
    %c0_i32_0 = arith.constant 0 : i32
    %c0_i32_1 = arith.constant 0 : i32
    return %c0_i32, %c0_i32_0 : i32, i32
  }
  func.func @transform_24(%arg0: i32) -> (i32, i32) {
    %c0_i32 = arith.constant 0 : i32
    %c0_i32_0 = arith.constant 0 : i32
    %c0_i32_1 = arith.constant 0 : i32
    return %c0_i32, %c0_i32_0 : i32, i32
  }
  func.func @transform_25(%arg0: i32) -> (i32, i32) {
    %c0_i32 = arith.constant 0 : i32
    %c0_i32_0 = arith.constant 0 : i32
    %c0_i32_1 = arith.constant 0 : i32
    return %c0_i32, %c0_i32_0 : i32, i32
  }
  func.func @transform_26(%arg0: i32) -> (i32, i32) {
    %c0_i32 = arith.constant 0 : i32
    %c0_i32_0 = arith.constant 0 : i32
    %c0_i32_1 = arith.constant 0 : i32
    return %c0_i32, %c0_i32_0 : i32, i32
  }
  func.func @transform_27(%arg0: i32) -> (i32, i32) {
    %c0_i32 = arith.constant 0 : i32
    %c0_i32_0 = arith.constant 0 : i32
    %c0_i32_1 = arith.constant 0 : i32
    return %c0_i32, %c0_i32_0 : i32, i32
  }
  func.func @transform_28(%arg0: i32) -> (i32, i32) {
    %c0_i32 = arith.constant 0 : i32
    %c0_i32_0 = arith.constant 0 : i32
    %c0_i32_1 = arith.constant 0 : i32
    return %c0_i32, %c0_i32_0 : i32, i32
  }
  func.func @transform_29(%arg0: i32) -> (i32, i32) {
    %c0_i32 = arith.constant 0 : i32
    %c0_i32_0 = arith.constant 0 : i32
    %c0_i32_1 = arith.constant 0 : i32
    return %c0_i32, %c0_i32_0 : i32, i32
  }
  func.func @transform_30(%arg0: i32) -> (i32, i32) {
    %c0_i32 = arith.constant 0 : i32
    %c0_i32_0 = arith.constant 0 : i32
    %c0_i32_1 = arith.constant 0 : i32
    return %c0_i32, %c0_i32_0 : i32, i32
  }
  func.func @transform_31(%arg0: i32) -> (i32, i32) {
    %c0_i32 = arith.constant 0 : i32
    %c0_i32_0 = arith.constant 0 : i32
    %c0_i32_1 = arith.constant 0 : i32
    return %c0_i32, %c0_i32_0 : i32, i32
  }
  func.func @transform_32(%arg0: i32) -> (i32, i32) {
    %c0_i32 = arith.constant 0 : i32
    %c0_i32_0 = arith.constant 0 : i32
    return %arg0, %c0_i32 : i32, i32
  }
}

</mosaic_0001>

<bundles_post_ra>
// kernel: mlp_forward.1
= control target key start
LH: loop header
LB: loop body
LE: loop exit
PB: predicated region body
PF: predicated region fallthrough
CT: control target
= control target key end

     0   :  { %s2800_s6 = smov 1   ;;  %s2801_s10 = smov 2   ;;  %s3336_s0 = inlined_call_operand.smem [shape: u32[33], index: -1, kind: input, shape index: {}] }
   0x1   :  { %s2875_s5 = sld [smem:[%s3336_s0]]   ;;  %s2802_s14 = smov 3  }
   0x2   :  { %s2880_s9 = sld [smem:[%s3336_s0 + %s2800_s6]]   ;;  %s2803_s18 = smov 4  }
   0x3   :  { %s2885_s13 = sld [smem:[%s3336_s0 + %s2801_s10]]   ;;  %s2804_s22 = smov 5  }
   0x4   :  { %s2890_s17 = sld [smem:[%s3336_s0 + %s2802_s14]]   ;;  %s2805_s26 = smov 6  }
   0x5   :  { %s2895_s21 = sld [smem:[%s3336_s0 + %s2803_s18]]   ;;  %s2806_s30 = smov 7  }
   0x6   :  { %s2900_s25 = sld [smem:[%s3336_s0 + %s2804_s22]]   ;;  %s2807_s4 = smov 8  }
   0x7   :  { %3341 = sst [smem:[#allocation37_spill]] %s2875_s5  ;;  %s2808_s10 = smov 9  }
   0x8   :  { %3342 = sst [smem:[#allocation38_spill]] %s2880_s9  ;;  %s2809_s15 = smov 10  }
   0x9   :  { %3343 = sst [smem:[#allocation39_spill]] %s2885_s13  ;;  %s2810_s20 = smov 11  }
   0xa   :  { %3344 = sst [smem:[#allocation40_spill]] %s2890_s17  ;;  %s2812_s1 = smov 13  }
   0xb   :  { %s2905_s29 = sld [smem:[%s3336_s0 + %s2805_s26]]   ;;  %s2811_s26 = smov 12  }
   0xc   :  { %3345 = sst [smem:[#allocation41_spill]] %s2900_s25  ;;  %s2813_s7 = smov 14  }
   0xd   :  { %s2910_s3 = sld [smem:[%s3336_s0 + %s2806_s30]]   ;;  %s2815_s22 = smov 16  }
   0xe   :  { %s2915_s8 = sld [smem:[%s3336_s0 + %s2807_s4]]   ;;  %s2816_s28 = smov 17  }
   0xf   :  { %s2920_s14 = sld [smem:[%s3336_s0 + %s2808_s10]]  }
  0x10   :  { %s2925_s19 = sld [smem:[%s3336_s0 + %s2809_s15]]   ;;  %s2814_s15 = smov 15  }
  0x11   :  { %3346 = sst [smem:[#allocation42_spill]] %s2905_s29 }
  0x12   :  { %s2930_s24 = sld [smem:[%s3336_s0 + %s2810_s20]]  }
  0x13   :  { %3347 = sst [smem:[#allocation43_spill]] %s2910_s3 }
  0x14   :  { %3348 = sst [smem:[#allocation44_spill]] %s2915_s8 }
  0x15   :  { %s2935_s30 = sld [smem:[%s3336_s0 + %s2811_s26]]  }
  0x16   :  { %s2940_s6 = sld [smem:[%s3336_s0 + %s2812_s1]]  }
  0x17   :  { %s2945_s12 = sld [smem:[%s3336_s0 + %s2813_s7]]   ;;  %s2817_s7 = smov 18  }
  0x18   :  { %s2950_s20 = sld [smem:[%s3336_s0 + %s2814_s15]]   ;;  %s2818_s15 = smov 19  }
  0x19   :  { %s2955_s27 = sld [smem:[%s3336_s0 + %s2815_s22]]   ;;  %s2819_s22 = smov 20  }
  0x1a   :  { %s2960_s4 = sld [smem:[%s3336_s0 + %s2816_s28]]   ;;  %s2820_s28 = smov 21  }
  0x1b   :  { %s2965_s9 = sld [smem:[%s3336_s0 + %s2817_s7]]   ;;  %s2821_s7 = smov 22  }
  0x1c   :  { %s2970_s17 = sld [smem:[%s3336_s0 + %s2818_s15]]   ;;  %s2822_s15 = smov 23  }
  0x1d   :  { %s2975_s3 = sld [smem:[%s3336_s0 + %s2819_s22]]   ;;  %s2823_s22 = smov 24  }
  0x1e   :  { %s2980_s29 = sld [smem:[%s3336_s0 + %s2820_s28]]   ;;  %s2824_s28 = smov 25  }
  0x1f   :  { %s2985_s5 = sld [smem:[%s3336_s0 + %s2821_s7]]   ;;  %s2825_s7 = smov 26  }
  0x20   :  { %s2990_s8 = sld [smem:[%s3336_s0 + %s2822_s15]]   ;;  %s2826_s15 = smov 27  }
  0x21   :  { %s2995_s25 = sld [smem:[%s3336_s0 + %s2823_s22]]   ;;  %s2827_s22 = smov 28  }
  0x22   :  { %s3000_s13 = sld [smem:[%s3336_s0 + %s2824_s28]]   ;;  %s2828_s28 = smov 29  }
  0x23   :  { %3349 = sst [smem:[#allocation45_spill]] %s2975_s3 }
  0x24   :  { %s3010_s3 = sld [smem:[%s3336_s0 + %s2826_s15]]   ;;  %s2830_s15 = smov 31  }
  0x25   :  { %3350 = sst [smem:[#allocation46_spill]] %s2985_s5 }
  0x26   :  { %s3005_s5 = sld [smem:[%s3336_s0 + %s2825_s7]]   ;;  %s2829_s7 = smov 30  }
  0x27   :  { %3351 = sst [smem:[#allocation47_spill]] %s2995_s25 }
  0x28   :  { %3352 = sst [smem:[#allocation48_spill]] %s3000_s13 }
  0x29   :  { %s3015_s25 = sld [smem:[%s3336_s0 + %s2827_s22]]   ;;  %s2831_s22 = smov 32  }
  0x2a   :  { %3354 = sst [smem:[#allocation50_spill]] %s3010_s3 }
  0x2b   :  { %s3020_s13 = sld [smem:[%s3336_s0 + %s2828_s28]]  }
  0x2c   :  { %3353 = sst [smem:[#allocation49_spill]] %s3005_s5 }
  0x2d   :  { %s3025_s5 = sld [smem:[%s3336_s0 + %s2829_s7]]  }
  0x2e   :  { %s3030_s3 = sld [smem:[%s3336_s0 + %s2830_s15]]  }
  0x2f   :  { %3355 = sst [smem:[#allocation51_spill]] %s3015_s25 }
  0x30   :  { %s3035_s25 = sld [smem:[%s3336_s0 + %s2831_s22]]  }
  0x31   :  { %70 = vsyncpa [#allocation3], 0 }
  0x32   :  { %71 = vsyncpa [#allocation5], 0 }
  0x33   :  { %72 = vsyncpa [#allocation8], 0 }
  0x34   :  { %73 = vsyncpa [#allocation11], 0 }
  0x35   :  { %74 = vsyncpa [#allocation14], 0 }
  0x36   :  { %75 = vsyncpa [#allocation17], 0 }
  0x37   :  { %76 = vsyncpa [#allocation20], 0 }
  0x38   :  { %77 = vsyncpa [#allocation23], 0 }
  0x39   :  { %78 = vsyncpa [#allocation26], 0  ;;  %s2832_s28 = smov [#allocation4]   ;;  %s2833_s2 = smov [#allocation7]  }
  0x3a   :  { %s111_s1 = sshll.u32 %s2832_s28, 4  ;;  %s131_s7 = sshll.u32 %s2833_s2, 4  ;;  %s112_s1 = int_to_ptr.vmem [resolvable:$true] %s111_s1  ;;  %s132_s7 = int_to_ptr.vmem [resolvable:$true] %s131_s7 }
  0x3b   :  { %s2408_s0 = scalar_lea.hbm %s2920_s14, 16 }
  0x3c   :  { %p2409_p0 = scmp.ne.s32.totalorder %s2920_s14, %s2408_s0  ;;  %p2412_p1 = scmp.lt.u32.totalorder %s2408_s0, %s2920_s14 }
  0x3e   :  { %p2414_p2 = pnand %p2412_p1, %p2409_p0 }
  0x40   :  { %2417 = shalt.err (!%p2414_p2)
}
  0x41   :  { %s2418_s10 = scalar_lea.vmem %s112_s1, 16  ;;  %s2422_s11 = scalar_lea.vmem %s112_s1, 32 }
  0x42   :  { %p2419_p3 = scmp.ne.s32.totalorder %s112_s1, %s2418_s10  ;;  %p2423_p4 = scmp.lt.s32.totalorder %s112_s1, %s112_s1 }
  0x43   :  { %p2424_p5 = scmp.lt.s32.totalorder %s2422_s11, %s2418_s10 }
  0x45   :  { %p2425_p6 = por %p2424_p5, %p2423_p4 }
  0x47   :  { %p2426_p7 = pnand %p2425_p6, %p2419_p3 }
  0x49   :  { %2429 = shalt.err (!%p2426_p7)
}
  0x4a   :  { %114 = dma.hbm_to_vmem [thread:$0]  %s2920_s14, 16, %s112_s1, [#allocation5]  }
  0x4b   :  { %s2430_s15 = scalar_lea.hbm %s2930_s24, 16 }
  0x4c   :  { %p2431_p8 = scmp.ne.s32.totalorder %s2930_s24, %s2430_s15  ;;  %p2434_p9 = scmp.lt.u32.totalorder %s2430_s15, %s2930_s24 }
  0x4e   :  { %p2436_p10 = pnand %p2434_p9, %p2431_p8 }
  0x50   :  { %2439 = shalt.err (!%p2436_p10)
}
  0x51   :  { %s2440_s16 = scalar_lea.vmem %s132_s7, 16  ;;  %s2444_s18 = scalar_lea.vmem %s132_s7, 32 }
  0x52   :  { %p2441_p11 = scmp.ne.s32.totalorder %s132_s7, %s2440_s16  ;;  %p2445_p12 = scmp.lt.s32.totalorder %s132_s7, %s132_s7 }
  0x53   :  { %p2446_p13 = scmp.lt.s32.totalorder %s2444_s18, %s2440_s16 }
  0x55   :  { %p2447_p0 = por %p2446_p13, %p2445_p12 }
  0x57   :  { %p2448_p1 = pnand %p2447_p0, %p2441_p11 }
  0x59   :  { %2451 = shalt.err (!%p2448_p1)
}
  0x5a   :  { %134 = dma.hbm_to_vmem [thread:$0]  %s2930_s24, 16, %s132_s7, [#allocation8]  }
  0x5b   :  { %s2834_s22 = smov [#allocation10]   ;;  %s2835_s23 = smov [#allocation13]  }
  0x5c   :  { %s153_s14 = sshll.u32 %s2834_s22, 4  ;;  %s175_s26 = sshll.u32 %s2835_s23, 4  ;;  %s154_s14 = int_to_ptr.vmem [resolvable:$true] %s153_s14  ;;  %s176_s26 = int_to_ptr.vmem [resolvable:$true] %s175_s26 }
  0x5d   :  { %s2452_s28 = scalar_lea.hbm %s2940_s6, 16 }
  0x5e   :  { %p2453_p2 = scmp.ne.s32.totalorder %s2940_s6, %s2452_s28  ;;  %p2456_p3 = scmp.lt.u32.totalorder %s2452_s28, %s2940_s6 }
  0x60   :  { %p2458_p4 = pnand %p2456_p3, %p2453_p2 }
  0x62   :  { %2461 = shalt.err (!%p2458_p4)
}
  0x63   :  { %s2462_s1 = scalar_lea.vmem %s154_s14, 16  ;;  %s2466_s2 = scalar_lea.vmem %s154_s14, 32 }
  0x64   :  { %p2463_p5 = scmp.ne.s32.totalorder %s154_s14, %s2462_s1  ;;  %p2467_p6 = scmp.lt.s32.totalorder %s154_s14, %s154_s14 }
  0x65   :  { %p2468_p7 = scmp.lt.s32.totalorder %s2466_s2, %s2462_s1 }
  0x67   :  { %p2469_p8 = por %p2468_p7, %p2467_p6 }
  0x69   :  { %p2470_p9 = pnand %p2469_p8, %p2463_p5 }
  0x6b   :  { %2473 = shalt.err (!%p2470_p9)
}
  0x6c   :  { %156 = dma.hbm_to_vmem [thread:$0]  %s2940_s6, 16, %s154_s14, [#allocation11]  }
  0x6d   :  { %s2474_s24 = scalar_lea.hbm %s2950_s20, 16 }
  0x6e   :  { %p2475_p10 = scmp.ne.s32.totalorder %s2950_s20, %s2474_s24  ;;  %p2478_p11 = scmp.lt.u32.totalorder %s2474_s24, %s2950_s20 }
  0x70   :  { %p2480_p12 = pnand %p2478_p11, %p2475_p10 }
  0x72   :  { %2483 = shalt.err (!%p2480_p12)
}
  0x73   :  { %s2484_s7 = scalar_lea.vmem %s176_s26, 16  ;;  %s2488_s0 = scalar_lea.vmem %s176_s26, 32 }
  0x74   :  { %p2485_p13 = scmp.ne.s32.totalorder %s176_s26, %s2484_s7  ;;  %p2489_p0 = scmp.lt.s32.totalorder %s176_s26, %s176_s26 }
  0x75   :  { %p2490_p1 = scmp.lt.s32.totalorder %s2488_s0, %s2484_s7 }
  0x77   :  { %p2491_p2 = por %p2490_p1, %p2489_p0 }
  0x79   :  { %p2492_p3 = pnand %p2491_p2, %p2485_p13 }
  0x7b   :  { %2495 = shalt.err (!%p2492_p3)
}
  0x7c   :  { %178 = dma.hbm_to_vmem [thread:$0]  %s2950_s20, 16, %s176_s26, [#allocation14]  }
  0x7d   :  { %s2836_s10 = smov [#allocation16]   ;;  %s2837_s11 = smov [#allocation19]  }
  0x7e   :  { %s197_s6 = sshll.u32 %s2836_s10, 4  ;;  %s217_s15 = sshll.u32 %s2837_s11, 4  ;;  %s198_s6 = int_to_ptr.vmem [resolvable:$true] %s197_s6  ;;  %s218_s15 = int_to_ptr.vmem [resolvable:$true] %s217_s15 }
  0x7f   :  { %s2496_s16 = scalar_lea.hbm %s2960_s4, 16 }
  0x80   :  { %p2497_p4 = scmp.ne.s32.totalorder %s2960_s4, %s2496_s16  ;;  %p2500_p5 = scmp.lt.u32.totalorder %s2496_s16, %s2960_s4 }
  0x82   :  { %p2502_p6 = pnand %p2500_p5, %p2497_p4 }
  0x84   :  { %2505 = shalt.err (!%p2502_p6)
}
  0x85   :  { %s2506_s18 = scalar_lea.vmem %s198_s6, 16  ;;  %s2510_s22 = scalar_lea.vmem %s198_s6, 32 }
  0x86   :  { %p2507_p7 = scmp.ne.s32.totalorder %s198_s6, %s2506_s18  ;;  %p2511_p8 = scmp.lt.s32.totalorder %s198_s6, %s198_s6 }
  0x87   :  { %p2512_p9 = scmp.lt.s32.totalorder %s2510_s22, %s2506_s18 }
  0x89   :  { %p2513_p10 = por %p2512_p9, %p2511_p8 }
  0x8b   :  { %p2514_p11 = pnand %p2513_p10, %p2507_p7 }
  0x8d   :  { %2517 = shalt.err (!%p2514_p11)
}
  0x8e   :  { %200 = dma.hbm_to_vmem [thread:$0]  %s2960_s4, 16, %s198_s6, [#allocation17]  }
  0x8f   :  { %s2518_s20 = scalar_lea.hbm %s2970_s17, 16 }
  0x90   :  { %p2519_p12 = scmp.ne.s32.totalorder %s2970_s17, %s2518_s20  ;;  %p2522_p13 = scmp.lt.u32.totalorder %s2518_s20, %s2970_s17 }
  0x92   :  { %p2524_p0 = pnand %p2522_p13, %p2519_p12 }
  0x94   :  { %2527 = shalt.err (!%p2524_p0)
}
  0x95   :  { %s2528_s14 = scalar_lea.vmem %s218_s15, 16  ;;  %s2532_s23 = scalar_lea.vmem %s218_s15, 32 }
  0x96   :  { %p2529_p1 = scmp.ne.s32.totalorder %s218_s15, %s2528_s14  ;;  %p2533_p2 = scmp.lt.s32.totalorder %s218_s15, %s218_s15 }
  0x97   :  { %p2534_p3 = scmp.lt.s32.totalorder %s2532_s23, %s2528_s14 }
  0x99   :  { %p2535_p4 = por %p2534_p3, %p2533_p2 }
  0x9b   :  { %p2536_p5 = pnand %p2535_p4, %p2529_p1 }
  0x9d   :  { %2539 = shalt.err (!%p2536_p5)
}
  0x9e   :  { %220 = dma.hbm_to_vmem [thread:$0]  %s2970_s17, 16, %s218_s15, [#allocation20]  }
  0x9f   :  { %s2838_s26 = smov [#allocation22]   ;;  %s2839_s28 = smov [#allocation25]  }
  0xa0   :  { %s238_s4 = sshll.u32 %s2838_s26, 4  ;;  %s263_s1 = sshll.u32 %s2839_s28, 4  ;;  %s239_s4 = int_to_ptr.vmem [resolvable:$true] %s238_s4  ;;  %s3061_s1 = int_to_ptr.vmem [resolvable:$true] %s263_s1 }
  0xa1   :  { %s2540_s2 = scalar_lea.hbm %s2980_s29, 1024 }
  0xa2   :  { %p2541_p6 = scmp.ne.s32.totalorder %s2980_s29, %s2540_s2  ;;  %p2544_p7 = scmp.lt.u32.totalorder %s2540_s2, %s2980_s29 }
  0xa4   :  { %p2546_p8 = pnand %p2544_p7, %p2541_p6 }
  0xa6   :  { %2549 = shalt.err (!%p2546_p8)
}
  0xa7   :  { %s2550_s24 = scalar_lea.vmem %s239_s4, 1024  ;;  %p2555_p10 = scmp.lt.s32.totalorder %s239_s4, %s239_s4 }
  0xa8   :  { %p2551_p9 = scmp.ne.s32.totalorder %s239_s4, %s2550_s24  ;;  %p2556_p11 = scmp.lt.s32.totalorder %s2550_s24, %s2550_s24 }
  0xaa   :  { %p2557_p12 = por %p2556_p11, %p2555_p10 }
  0xac   :  { %p2558_p13 = pnand %p2557_p12, %p2551_p9 }
  0xae   :  { %2561 = shalt.err (!%p2558_p13)
}
  0xaf   :  { %s2840_s17 = smov 64   ;;  %s2841_s7 = smov 4  }
  0xb0   :  { %244 = dma.hbm_to_vmem [thread:$0]  %s2980_s29, 1024, %s239_s4, [#allocation23], %s2840_s17, %s2840_s17, %s2841_s7  }
  0xb1   :  { %s2562_s0 = scalar_lea.hbm %s2990_s8, 16 }
  0xb2   :  { %p2563_p0 = scmp.ne.s32.totalorder %s2990_s8, %s2562_s0  ;;  %p2566_p1 = scmp.lt.u32.totalorder %s2562_s0, %s2990_s8 }
  0xb4   :  { %p2568_p2 = pnand %p2566_p1, %p2563_p0 }
  0xb6   :  { %2571 = shalt.err (!%p2568_p2)
}
  0xb7   :  { %s2572_s10 = scalar_lea.vmem %s3061_s1, 16  ;;  %s2576_s6 = scalar_lea.vmem %s3061_s1, 32 }
  0xb8   :  { %p2573_p3 = scmp.ne.s32.totalorder %s3061_s1, %s2572_s10  ;;  %p2577_p4 = scmp.lt.s32.totalorder %s3061_s1, %s3061_s1 }
  0xb9   :  { %p2578_p5 = scmp.lt.s32.totalorder %s2576_s6, %s2572_s10 }
  0xbb   :  { %p2579_p6 = por %p2578_p5, %p2577_p4 }
  0xbd   :  { %p2580_p7 = pnand %p2579_p6, %p2573_p3 }
  0xbf   :  { %2583 = shalt.err (!%p2580_p7)
}
  0xc0   :  { %266 = dma.hbm_to_vmem [thread:$0]  %s2990_s8, 16, %s3061_s1, [#allocation26]  }
  0xc1   :  { %s2842_s29 = smov [#allocation2]   ;;  %s2843_s15 = smov [#allocation6]  }
  0xc2   :  { %s93_s11 = sshll.u32 %s2842_s29, 4  ;;  %s121_s16 = sshll.u32 %s2843_s15, 4  ;;  %s94_s11 = int_to_ptr.vmem [resolvable:$true] %s93_s11  ;;  %s122_s16 = int_to_ptr.vmem [resolvable:$true] %s121_s16 }
  0xc3   :  { %s2584_s18 = scalar_lea.hbm %s2895_s21, 128 }
  0xc4   :  { %p2585_p8 = scmp.ne.s32.totalorder %s2895_s21, %s2584_s18  ;;  %p2588_p9 = scmp.lt.u32.totalorder %s2584_s18, %s2895_s21 }
  0xc6   :  { %p2590_p10 = pnand %p2588_p9, %p2585_p8 }
  0xc8   :  { %2593 = shalt.err (!%p2590_p10)
}
  0xc9   :  { %s2594_s22 = scalar_lea.vmem %s94_s11, 128  ;;  %p2599_p12 = scmp.lt.s32.totalorder %s94_s11, %s94_s11 }
  0xca   :  { %p2595_p11 = scmp.ne.s32.totalorder %s94_s11, %s2594_s22  ;;  %p2600_p13 = scmp.lt.s32.totalorder %s2594_s22, %s2594_s22 }
  0xcc   :  { %p2601_p0 = por %p2600_p13, %p2599_p12 }
  0xce   :  { %p2602_p1 = pnand %p2601_p0, %p2595_p11 }
  0xd0   :  { %2605 = shalt.err (!%p2602_p1)
}
  0xd1   :  { %96 = dma.hbm_to_vmem [thread:$0]  %s2895_s21, 128, %s94_s11, [#allocation3]  }
  0xd2   :  { %s2606_s8 = scalar_lea.hbm %s2925_s19, 16 }
  0xd3   :  { %p2607_p2 = scmp.ne.s32.totalorder %s2925_s19, %s2606_s8  ;;  %p2610_p3 = scmp.lt.u32.totalorder %s2606_s8, %s2925_s19 }
  0xd5   :  { %p2612_p4 = pnand %p2610_p3, %p2607_p2 }
  0xd7   :  { %2615 = shalt.err (!%p2612_p4)
}
  0xd8   :  { %s2616_s20 = scalar_lea.vmem %s122_s16, 16  ;;  %s2620_s14 = scalar_lea.vmem %s122_s16, 32 }
  0xd9   :  { %p2617_p5 = scmp.ne.s32.totalorder %s122_s16, %s2616_s20  ;;  %p2621_p6 = scmp.lt.s32.totalorder %s122_s16, %s122_s16 }
  0xda   :  { %p2622_p7 = scmp.lt.s32.totalorder %s2620_s14, %s2616_s20 }
  0xdc   :  { %p2623_p8 = por %p2622_p7, %p2621_p6 }
  0xde   :  { %p2624_p9 = pnand %p2623_p8, %p2617_p5 }
  0xe0   :  { %2627 = shalt.err (!%p2624_p9)
}
  0xe1   :  { %124 = dma.hbm_to_vmem [thread:$0]  %s2925_s19, 16, %s122_s16, [#allocation5]  }
  0xe2   :  { %s2844_s23 = smov [#allocation9]   ;;  %s2845_s26 = smov [#allocation12]  }
  0xe3   :  { %s140_s21 = sshll.u32 %s2844_s23, 4  ;;  %s162_s4 = sshll.u32 %s2845_s26, 4  ;;  %s141_s21 = int_to_ptr.vmem [resolvable:$true] %s140_s21  ;;  %s3088_s4 = int_to_ptr.vmem [resolvable:$true] %s162_s4 }
  0xe4   :  { %s2628_s28 = scalar_lea.hbm %s2935_s30, 1024 }
  0xe5   :  { %p2629_p10 = scmp.ne.s32.totalorder %s2935_s30, %s2628_s28  ;;  %p2632_p11 = scmp.lt.u32.totalorder %s2628_s28, %s2935_s30 }
  0xe7   :  { %p2634_p12 = pnand %p2632_p11, %p2629_p10 }
  0xe9   :  { %2637 = shalt.err (!%p2634_p12)
}
  0xea   :  { %s2638_s1 = scalar_lea.vmem %s141_s21, 1024  ;;  %p2643_p0 = scmp.lt.s32.totalorder %s141_s21, %s141_s21 }
  0xeb   :  { %p2639_p13 = scmp.ne.s32.totalorder %s141_s21, %s2638_s1  ;;  %p2644_p1 = scmp.lt.s32.totalorder %s2638_s1, %s2638_s1 }
  0xed   :  { %p2645_p2 = por %p2644_p1, %p2643_p0 }
  0xef   :  { %p2646_p3 = pnand %p2645_p2, %p2639_p13 }
  0xf1   :  { %2649 = shalt.err (!%p2646_p3)
}
  0xf2   :  { %146 = dma.hbm_to_vmem [thread:$0]  %s2935_s30, 1024, %s141_s21, [#allocation8], %s2840_s17, %s2840_s17, %s2841_s7  }
  0xf3   :  { %s2650_s19 = scalar_lea.hbm %s2945_s12, 1024 }
  0xf4   :  { %p2651_p4 = scmp.ne.s32.totalorder %s2945_s12, %s2650_s19  ;;  %p2654_p5 = scmp.lt.u32.totalorder %s2650_s19, %s2945_s12 }
  0xf6   :  { %p2656_p6 = pnand %p2654_p5, %p2651_p4 }
  0xf8   :  { %2659 = shalt.err (!%p2656_p6)
}
  0xf9   :  { %s2660_s2 = scalar_lea.vmem %s3088_s4, 1024  ;;  %p2665_p8 = scmp.lt.s32.totalorder %s3088_s4, %s3088_s4 }
  0xfa   :  { %p2661_p7 = scmp.ne.s32.totalorder %s3088_s4, %s2660_s2  ;;  %p2666_p9 = scmp.lt.s32.totalorder %s2660_s2, %s2660_s2 }
  0xfc   :  { %p2667_p10 = por %p2666_p9, %p2665_p8 }
  0xfe   :  { %p2668_p11 = pnand %p2667_p10, %p2661_p7 }
 0x100   :  { %2671 = shalt.err (!%p2668_p11)
}
 0x101   :  { %168 = dma.hbm_to_vmem [thread:$0]  %s2945_s12, 1024, %s3088_s4, [#allocation11], %s2840_s17, %s2840_s17, %s2841_s7  }
 0x102   :  { %s2846_s30 = smov [#allocation15]   ;;  %s2847_s0 = smov [#allocation18]  }
 0x103   :  { %s184_s24 = sshll.u32 %s2846_s30, 4  ;;  %s207_s10 = sshll.u32 %s2847_s0, 4  ;;  %s185_s24 = int_to_ptr.vmem [resolvable:$true] %s184_s24  ;;  %s208_s10 = int_to_ptr.vmem [resolvable:$true] %s207_s10 }
 0x104   :  { %s2672_s6 = scalar_lea.hbm %s2955_s27, 1024 }
 0x105   :  { %p2673_p12 = scmp.ne.s32.totalorder %s2955_s27, %s2672_s6  ;;  %p2676_p13 = scmp.lt.u32.totalorder %s2672_s6, %s2955_s27 }
 0x107   :  { %p2678_p0 = pnand %p2676_p13, %p2673_p12 }
 0x109   :  { %2681 = shalt.err (!%p2678_p0)
}
 0x10a   :  { %s2682_s29 = scalar_lea.vmem %s185_s24, 1024  ;;  %p2687_p2 = scmp.lt.s32.totalorder %s185_s24, %s185_s24 }
 0x10b   :  { %p2683_p1 = scmp.ne.s32.totalorder %s185_s24, %s2682_s29  ;;  %p2688_p3 = scmp.lt.s32.totalorder %s2682_s29, %s2682_s29 }
 0x10d   :  { %p2689_p4 = por %p2688_p3, %p2687_p2 }
 0x10f   :  { %p2690_p5 = pnand %p2689_p4, %p2683_p1 }
 0x111   :  { %2693 = shalt.err (!%p2690_p5)
}
 0x112   :  { %190 = dma.hbm_to_vmem [thread:$0]  %s2955_s27, 1024, %s185_s24, [#allocation14], %s2840_s17, %s2840_s17, %s2841_s7  }
 0x113   :  { %s2694_s12 = scalar_lea.hbm %s2965_s9, 64 }
 0x114   :  { %p2695_p6 = scmp.ne.s32.totalorder %s2965_s9, %s2694_s12  ;;  %p2698_p7 = scmp.lt.u32.totalorder %s2694_s12, %s2965_s9 }
 0x116   :  { %p2700_p8 = pnand %p2698_p7, %p2695_p6 }
 0x118   :  { %2703 = shalt.err (!%p2700_p8)
}
 0x119   :  { %s2704_s11 = scalar_lea.vmem %s208_s10, 64  ;;  %p2709_p10 = scmp.lt.s32.totalorder %s208_s10, %s208_s10 }
 0x11a   :  { %p2705_p9 = scmp.ne.s32.totalorder %s208_s10, %s2704_s11  ;;  %p2710_p11 = scmp.lt.s32.totalorder %s2704_s11, %s2704_s11 }
 0x11c   :  { %p2711_p12 = por %p2710_p11, %p2709_p10 }
 0x11e   :  { %p2712_p13 = pnand %p2711_p12, %p2705_p9 }
 0x120   :  { %2715 = shalt.err (!%p2712_p13)
}
 0x121   :  { %s3356_s15 = sld [smem:[#allocation45_spill]]  ;;  %s2848_s16 = smov [#allocation21]  }
 0x122   :  { %210 = dma.hbm_to_vmem [thread:$0]  %s2965_s9, 64, %s208_s10, [#allocation17]  }
 0x123   :  { %s226_s18 = sshll.u32 %s2848_s16, 4  ;;  %s2849_s27 = smov [#allocation24]   ;;  %s227_s18 = int_to_ptr.vmem [resolvable:$true] %s226_s18 }
 0x124   :  { %s250_s22 = sshll.u32 %s2849_s27, 4  ;;  %s3120_s22 = int_to_ptr.vmem [resolvable:$true] %s250_s22 }
 0x127   :  { %s2716_s8 = scalar_lea.hbm %s3356_s15, 1024 }
 0x128   :  { %p2717_p0 = scmp.ne.s32.totalorder %s3356_s15, %s2716_s8  ;;  %p2720_p1 = scmp.lt.u32.totalorder %s2716_s8, %s3356_s15 }
 0x12a   :  { %p2722_p2 = pnand %p2720_p1, %p2717_p0 }
 0x12c   :  { %2725 = shalt.err (!%p2722_p2)
}
 0x12d   :  { %s2726_s20 = scalar_lea.vmem %s227_s18, 1024  ;;  %p2731_p4 = scmp.lt.s32.totalorder %s227_s18, %s227_s18 }
 0x12e   :  { %p2727_p3 = scmp.ne.s32.totalorder %s227_s18, %s2726_s20  ;;  %p2732_p5 = scmp.lt.s32.totalorder %s2726_s20, %s2726_s20 }
 0x130   :  { %p2733_p6 = por %p2732_p5, %p2731_p4 }
 0x132   :  { %p2734_p7 = pnand %p2733_p6, %p2727_p3 }
 0x134   :  { %2737 = shalt.err (!%p2734_p7)
}
 0x135   :  { %s3357_s9 = sld [smem:[#allocation46_spill]] }
 0x136   :  { %232 = dma.hbm_to_vmem [thread:$0]  %s3356_s15, 1024, %s227_s18, [#allocation20], %s2840_s17, %s2840_s17, %s2841_s7  }
 0x13b   :  { %s2738_s14 = scalar_lea.hbm %s3357_s9, 1024 }
 0x13c   :  { %p2739_p8 = scmp.ne.s32.totalorder %s3357_s9, %s2738_s14  ;;  %p2742_p9 = scmp.lt.u32.totalorder %s2738_s14, %s3357_s9 }
 0x13e   :  { %p2744_p10 = pnand %p2742_p9, %p2739_p8 }
 0x140   :  { %2747 = shalt.err (!%p2744_p10)
}
 0x141   :  { %s2748_s23 = scalar_lea.vmem %s3120_s22, 1024  ;;  %p2753_p12 = scmp.lt.s32.totalorder %s3120_s22, %s3120_s22 }
 0x142   :  { %p2749_p11 = scmp.ne.s32.totalorder %s3120_s22, %s2748_s23  ;;  %p2754_p13 = scmp.lt.s32.totalorder %s2748_s23, %s2748_s23 }
 0x144   :  { %p2755_p0 = por %p2754_p13, %p2753_p12 }
 0x146   :  { %p2756_p1 = pnand %p2755_p0, %p2749_p11 }
 0x148   :  { %2759 = shalt.err (!%p2756_p1)
}
 0x149   :  { %256 = dma.hbm_to_vmem [thread:$0]  %s3357_s9, 1024, %s3120_s22, [#allocation23], %s2840_s17, %s2840_s17, %s2841_s7  }
 0x14a   :  { %s2850_s21 = smov [#allocation27]   ;;  %s2760_s4 = scalar_lea.hbm %s3025_s5, 1024 }
 0x14b   :  { %s284_s26 = sshll.u32 %s2850_s21, 4  ;;  %p2761_p2 = scmp.ne.s32.totalorder %s3025_s5, %s2760_s4  ;;  %s285_s26 = int_to_ptr.vmem [resolvable:$true] %s284_s26 }
 0x14c   :  { %p2764_p3 = scmp.lt.u32.totalorder %s2760_s4, %s3025_s5 }
 0x14e   :  { %p2766_p4 = pnand %p2764_p3, %p2761_p2 }
 0x150   :  { %2769 = shalt.err (!%p2766_p4)
}
 0x151   :  { %s2770_s28 = scalar_lea.vmem %s285_s26, 1024  ;;  %p2775_p6 = scmp.lt.s32.totalorder %s285_s26, %s285_s26 }
 0x152   :  { %p2771_p5 = scmp.ne.s32.totalorder %s285_s26, %s2770_s28  ;;  %p2776_p7 = scmp.lt.s32.totalorder %s2770_s28, %s2770_s28 }
 0x154   :  { %p2777_p8 = por %p2776_p7, %p2775_p6 }
 0x156   :  { %p2778_p9 = pnand %p2777_p8, %p2771_p5 }
 0x158   :  { %2781 = shalt.err (!%p2778_p9)
}
 0x159   :  { %290 = dma.hbm_to_vmem [thread:$0]  %s3025_s5, 1024, %s285_s26, [#allocation26], %s2840_s17, %s2840_s17, %s2841_s7  }
 0x15a   :  { %2782 = dma.done.wait [#allocation3], 128  }
 0x15b   :  { %2783 = vsyncadd [#allocation3], 4294967168 }
 0x15c   :  { %2784 = dma.done.wait [#allocation5], 32  }
 0x15d   :  { %2785 = vsyncadd [#allocation5], 4294967264 }
 0x15e   :  { %2786 = dma.done.wait [#allocation8], 1040  }
 0x15f   :  { %2787 = vsyncadd [#allocation8], 4294966256 }
 0x160   :  { %2788 = dma.done.wait [#allocation11], 1040  }
 0x161   :  { %2789 = vsyncadd [#allocation11], 4294966256 }
 0x162   :  { %2790 = dma.done.wait [#allocation14], 1040  }
 0x163   :  { %2791 = vsyncadd [#allocation14], 4294966256 }
 0x164   :  { %2792 = dma.done.wait [#allocation17], 80  }
 0x165   :  { %2793 = vsyncadd [#allocation17], 4294967216 }
 0x166   :  { %2794 = dma.done.wait [#allocation20], 1040  }
 0x167   :  { %2795 = vsyncadd [#allocation20], 4294966256 }
 0x168   :  { %2796 = dma.done.wait [#allocation23], 2048  }
 0x169   :  { %2797 = vsyncadd [#allocation23], 4294965248 }
 0x16a   :  { %2798 = dma.done.wait [#allocation26], 1040  }
 0x16b   :  { %2799 = vsyncadd [#allocation26], 4294966256  ;;  %s3358_s1 = sld [smem:[#allocation39_spill]]  ;;  %v2851_v0 = vmov 2   ;;  %v2852_v1 = vmov 0   ;;  %v2853_v3 = vmov 3   ;;  %v345_v9 = vlaneseq }
 0x16c   :  { %2312 = vset.pattern.permute.xlu1 %v2851_v0  ;;  %2310 = vset.pattern.permute.xlu0 %v2852_v1  ;;  %v2854_v4 = vmov 1   ;;  %v2855_v5 = vmov 4   ;;  %v2856_v6 = vmov 5   ;;  %v2857_v7 = vmov 6   ;;  %s3359_s5 = sld [smem:[#allocation41_spill]]  ;;  %v350_v12 = vld [vmem:[#allocation2] sm:$0xff] }
 0x16d   :  { %v2858_v8 = vmov 7   ;;  %v3152_v10 = vshrl.u32 %v345_v9, 7  ;;  %s3360_s17 = sld [smem:[#allocation44_spill]]  ;;  %v2859_v54 = vmov 0.0   ;;  %v3177_v56 = vand.u32 127, %v345_v9  ;;  %s3361_s7 = sld [smem:[#allocation37_spill]] }
 0x16e   :  { %2059 = vmatprep.subr.bf16.mxu0 %v2859_v54  ;;  %2079 = vmatprep.subr.bf16.mxu1 %v2859_v54  ;;  %vm2860_vm1 = vmmov 0   ;;  %s3362_s19 = sld [smem:[#allocation42_spill]]  ;;  %s3363_s2 = sld [smem:[#allocation43_spill]] }
 0x16f   :  { %v366_v11 = vsub.s32 0, %v3152_v10  ;;  %v376_v14 = vsub.s32 1, %v3152_v10  ;;  %v386_v15 = vsub.s32 2, %v3152_v10  ;;  %v396_v20 = vsub.s32 3, %v3152_v10  ;;  %2075 = vmatprep.mubr.msk.bf16.mxu0 %vm2860_vm1, %v2859_v54  ;;  %2095 = vmatprep.mubr.msk.bf16.mxu1 %vm2860_vm1, %v2859_v54  ;;  %s3364_s30 = sld [smem:[#allocation40_spill]]  ;;  %s3365_s24 = sld [smem:[#allocation38_spill]] }
 0x170   :  { %v406_v22 = vsub.s32 4, %v3152_v10  ;;  %v416_v27 = vsub.s32 5, %v3152_v10  ;;  %v426_v34 = vsub.s32 6, %v3152_v10  ;;  %v436_v43 = vsub.s32 7, %v3152_v10  ;;  %v2368_v10 = vld [vmem:[#allocation22 + $0x30] sm:$0xff]   ;;  %s3366_s0 = sld [smem:[#allocation49_spill]] }
 0x171   :  { %v349_v2 = vld [vmem:[%s3358_s1] sm:$0xff]  ;;  %v367_v13 = vrot.slane %v350_v12, %v366_v11  ;;  %v377_v21 = vrot.slane %v350_v12, %v376_v14  ;;  %v387_v23 = vrot.slane %v350_v12, %v386_v15  ;;  %v397_v28 = vrot.slane %v350_v12, %v396_v20  ;;  %s3367_s10 = sld [smem:[#allocation47_spill]]  ;;  %s3368_s6 = sld [smem:[#allocation48_spill]] }
 0x172   :  { %381 = vperm.xlu1 %2312, %v349_v2   ;;  %361 = vperm.xlu0 %2310, %v349_v2   ;;  %v1880_v18 = vld [vmem:[%s3359_s5] ss:$0 sm:$0xff]  ;;  %v407_v30 = vrot.slane %v350_v12, %v406_v22  ;;  %v417_v33 = vrot.slane %v350_v12, %v416_v27  ;;  %v427_v42 = vrot.slane %v350_v12, %v426_v34  ;;  %vm347_vm0 = vcmp.lt.s32.totalorder %v3177_v56, 32  ;;  %s3369_s29 = sld [smem:[#allocation50_spill]]  ;;  %s3370_s12 = sld [smem:[#allocation51_spill]] }
 0x173   :  { %v437_v48 = vrot.slane %v350_v12, %v436_v43  ;;  %v2324_v53 = vld [vmem:[%s3360_s17] sm:$0xff]   ;;  %v2325_v55 = vld [vmem:[%s3360_s17 + $0x8] sm:$0xff]   ;;  %v2326_v62 = vld [vmem:[%s3360_s17 + $0x10] sm:$0xff]  }
 0x174   :  { %2060 = vmatpush3.bf16.msra.mxu0 %v2324_v53  ;;  %v2327_v63 = vld [vmem:[%s3360_s17 + $0x18] sm:$0xff]   ;;  %v2866_v53 = vmov 1326507024  }
 0x175   :  { %2061 = vmatprep.subr.bf16.mxu0 %v2859_v54 }
 0x176   :  { %2313 = vset.pattern.permute.xlu1 %v2853_v3  ;;  %2311 = vset.pattern.permute.xlu0 %v2854_v4 }
 0x177   :  { %391 = vperm.xlu1 %2313, %v349_v2   ;;  %371 = vperm.xlu0 %2311, %v349_v2  }
 0x178   :  { %2062 = vmatpush3.bf16.msra.mxu0 %v2325_v55 }
 0x179   :  { %2063 = vmatprep.subr.bf16.mxu0 %v2859_v54 }
 0x17b   :  { %2314 = vset.pattern.permute.xlu1 %v2855_v5  ;;  %2315 = vset.pattern.permute.xlu0 %v2856_v6  ;;  %v2330_v5 = vld [vmem:[%s3360_s17 + $0x30] sm:$0xff]   ;;  %v2331_v6 = vld [vmem:[%s3360_s17 + $0x38] sm:$0xff]  }
 0x17c   :  { %401 = vperm.xlu1 %2314, %v349_v2   ;;  %411 = vperm.xlu0 %2315, %v349_v2  }
 0x17d   :  { %2064 = vmatpush3.bf16.msra.mxu0 %v2326_v62 }
 0x17e   :  { %2065 = vmatprep.subr.bf16.mxu0 %v2859_v54 }
 0x180   :  { %2316 = vset.pattern.permute.xlu1 %v2857_v7  ;;  %2318 = vset.pattern.permute.xlu0 %v2852_v1  ;;  %v724_v7 = vld [vmem:[%s3361_s7] sm:$0xff] }
 0x181   :  { %421 = vperm.xlu1 %2316, %v349_v2   ;;  %2066 = vmatpush3.bf16.msra.mxu0 %v2327_v63 }
 0x182   :  { %2067 = vmatprep.subr.bf16.mxu0 %v2859_v54 }
 0x185   :  { %2317 = vset.pattern.permute.xlu1 %v2858_v8 }
 0x186   :  { %431 = vperm.xlu1 %2317, %v349_v2   ;;  %v2329_v2 = vld [vmem:[%s3360_s17 + $0x28] sm:$0xff]  }
 0x18a   :  { %2319 = vset.pattern.permute.xlu1 %v2852_v1  ;;  %v2328_v1 = vld [vmem:[%s3360_s17 + $0x20] sm:$0xff]  }
 0x18b   :  { %2068 = vmatpush3.bf16.msra.mxu0 %v2328_v1 }
 0x18c   :  { %2069 = vmatprep.subr.bf16.mxu0 %v2859_v54 }
 0x18f   :  { %2070 = vmatpush3.bf16.msra.mxu0 %v2329_v2 }
 0x190   :  { %2071 = vmatprep.subr.bf16.mxu0 %v2859_v54 }
 0x193   :  { %2072 = vmatpush3.bf16.msra.mxu0 %v2330_v5 }
 0x194   :  { %2073 = vmatprep.subr.bf16.mxu0 %v2859_v54 }
 0x197   :  { %2074 = vmatpush3.bf16.msra.mxu0 %v2331_v6 }
 0x198   :  { %2099 = vmatprep.subr.bf16.mxu0 %v2859_v54 }
 0x1f1   :  { %v382_v16 = vpop.permute.xlu1 %381  ;;  %v362_v17 = vpop.permute.xlu0 %361 }
 0x1f2   :  { %v368_v19 = vmul.f32 %v367_v13, %v362_v17  ;;  %v388_v31 = vmul.f32 %v387_v23, %v382_v16  ;;  %v1881_v16 = vld [vmem:[%s3362_s19] ss:$0 sm:$0xff] }
 0x1f4   :  { %v369_v24 = vadd.f32 %v1880_v18, %v368_v19  ;;  %v1882_v18 = vld [vmem:[%s3363_s2] ss:$0 sm:$0xff] }
 0x1f6   :  { %v392_v25 = vpop.permute.xlu1 %391  ;;  %v372_v26 = vpop.permute.xlu0 %371 }
 0x1f7   :  { %v378_v29 = vmul.f32 %v377_v21, %v372_v26  ;;  %v398_v35 = vmul.f32 %v397_v28, %v392_v25 }
 0x1f9   :  { %v379_v32 = vadd.f32 %v378_v29, %v369_v24  ;;  %v1903_v24 = vld [vmem:[%s3364_s30] ss:$0 sm:$0xff] }
 0x1fb   :  { %v389_v36 = vadd.f32 %v388_v31, %v379_v32  ;;  %v402_v37 = vpop.permute.xlu1 %401  ;;  %v412_v38 = vpop.permute.xlu0 %411 }
 0x1fc   :  { %v408_v39 = vmul.f32 %v407_v30, %v402_v37  ;;  %v418_v41 = vmul.f32 %v417_v33, %v412_v38  ;;  %v2861_v38 = vmov 683565275  }
 0x1fd   :  { %v399_v40 = vadd.f32 %v398_v35, %v389_v36 }
 0x1ff   :  { %v409_v44 = vadd.f32 %v408_v39, %v399_v40  ;;  %v2862_v40 = vmov 2475754826  }
 0x200   :  { %v422_v45 = vpop.permute.xlu1 %421 }
 0x201   :  { %v419_v46 = vadd.f32 %v418_v41, %v409_v44  ;;  %v428_v47 = vmul.f32 %v427_v42, %v422_v45  ;;  %v2863_v42 = vmov 2131351028   ;;  %v2864_v44 = vmov 2102212464  }
 0x203   :  { %v429_v50 = vadd.f32 %v428_v47, %v419_v46  ;;  %v2865_v46 = vmov 920167782  }
 0x205   :  { %v432_v49 = vpop.permute.xlu1 %431 }
 0x206   :  { %v438_v51 = vmul.f32 %v437_v48, %v432_v49 }
 0x208   :  { %v439_v52 = vadd.f32 %v438_v51, %v429_v50 }
 0x20a   :  { %440 = vadd.xlane.f32.xlu0 %v439_v52 }
 0x220   :  { %728 = vperm.xlu0 %2318, %v724_v7  }
 0x224   :  { %2323 = vset.pattern.permute.xlu0 %v2853_v3 }
 0x297   :  { %v441_v57 = vpop.xlane.xlu0 %440 }
 0x298   :  { %v442_v58 = vmul.f32 0.03125, %v441_v57 }
 0x29a   :  { %v443_v59 = vsub.f32 %v439_v52, %v442_v58 }
 0x29c   :  { %v446_v60 = vsel %vm347_vm0, %v443_v59, 0.0 }
 0x29d   :  { %v447_v61 = vmul.f32 %v446_v60, %v446_v60 }
 0x29f   :  { %448 = vadd.xlane.f32.xlu1 %v447_v61  ;;  %v729_v25 = vpop.permute.xlu0 %728 }
 0x2a0   :  { %v3203_v26 = vmul.f32 %v1903_v24, %v729_v25 }
 0x2a2   :  { %v742_v27 = vand.u32 2139095040, %v3203_v26  ;;  %v739_v29 = vand.u32 2147483647, %v3203_v26  ;;  %vm741_vm9 = vcmp.lt.s32.totalorder %v3203_v26, 0 }
 0x2a4   :  { %v743_v28 = vshrl.u32 %v742_v27, 23  ;;  %v746_v32 = vand.u32 8388607, %v739_v29  ;;  %vm740_vm10 = vcmp.le.f32.partialorder %v739_v29, 0.7853982 }
 0x2a6   :  { %v1904_v30 = vadd.s32 4294967169, %v743_v28  ;;  %v747_v35 = vor.u32 8388608, %v746_v32 }
 0x2a8   :  { %v749_v31 = vadd.s32 1, %v1904_v30  ;;  %v787_v57 = vshll.u32 %v747_v35, 8 }
 0x2aa   :  { %vm750_vm2 = vcmp.gt.s32.totalorder %v749_v31, 0 }
 0x2ab   :  { %v751_v33 = vsel %vm750_vm2, %v749_v31, 0 }
 0x2ac   :  { %v753_v34 = vand.u32 31, %v751_v33  ;;  %v752_v36 = vshrl.u32 %v751_v33, 5 }
 0x2ae   :  { %v754_v37 = vsub.s32 32, %v753_v34  ;;  %v756_v39 = vshll.u32 %v2861_v38, %v753_v34  ;;  %v759_v41 = vshll.u32 %v2862_v40, %v753_v34  ;;  %v762_v43 = vshll.u32 %v2863_v42, %v753_v34 }
 0x2af   :  { %v765_v45 = vshll.u32 %v2864_v44, %v753_v34  ;;  %v768_v47 = vshll.u32 %v2865_v46, %v753_v34  ;;  %vm771_vm3 = vcmp.lt.s32.totalorder %v752_v36, 1  ;;  %vm774_vm4 = vcmp.lt.s32.totalorder %v752_v36, 4 }
 0x2b0   :  { %v755_v48 = vshrl.u32 %v2861_v38, %v754_v37  ;;  %v757_v49 = vshrl.u32 %v2862_v40, %v754_v37  ;;  %v760_v50 = vshrl.u32 %v2863_v42, %v754_v37  ;;  %v763_v51 = vshrl.u32 %v2864_v44, %v754_v37 }
 0x2b1   :  { %v766_v52 = vshrl.u32 %v2865_v46, %v754_v37  ;;  %v769_v55 = vshrl.u32 %v2866_v53, %v754_v37  ;;  %vm772_vm5 = vcmp.lt.s32.totalorder %v752_v36, 2  ;;  %vm773_vm6 = vcmp.lt.s32.totalorder %v752_v36, 3 }
 0x2b2   :  { %v758_v58 = vor.u32 %v757_v49, %v756_v39  ;;  %v764_v60 = vor.u32 %v763_v51, %v762_v43 }
 0x2b3   :  { %v767_v61 = vor.u32 %v766_v52, %v765_v45  ;;  %v770_v62 = vor.u32 %v769_v55, %v768_v47 }
 0x2b4   :  { %v775_v63 = vsel %vm771_vm3, %v755_v48, %v758_v58  ;;  %v776_v1 = vsel %vm774_vm4, %v764_v60, 2102212464 }
 0x2b5   :  { %v780_v7 = vsel %vm774_vm4, %v767_v61, 920167782 }
 0x32c   :  { %v449_v8 = vpop.xlane.xlu1 %448 }
 0x32d   :  { %v450_v9 = vmul.f32 0.03125, %v449_v8  ;;  %v784_v8 = vsel %vm774_vm4, %v770_v62, 1326507024  ;;  %vm738_vm4 = vcmp.lt.s32.totalorder %v3177_v56, 8 }
 0x32f   :  { %v451_v12 = vadd.f32 1e-05, %v450_v9  ;;  %v781_v9 = vsel %vm773_vm6, %v764_v60, %v780_v7  ;;  %v2336_v7 = vld [vmem:[#allocation12 + $0x20] sm:$0xff]  }
 0x331   :  { %2396 = vrsqrt.f32 %v451_v12  ;;  %v785_v12 = vsel %vm773_vm6, %v767_v61, %v784_v8  ;;  %v2334_v61 = vld [vmem:[#allocation12 + $0x10] sm:$0xff]  }
 0x33b   :  { %v2397_v13 = vpop.eup %2396 }
 0x33c   :  { %v453_v17 = vmul.f32 %v2397_v13, %v443_v59  ;;  %v761_v59 = vor.u32 %v760_v50, %v759_v41 }
 0x33e   :  { %v461_v19 = vmul.f32 %v1881_v16, %v453_v17  ;;  %v779_v2 = vsel %vm771_vm3, %v758_v58, %v761_v59  ;;  %v783_v5 = vsel %vm771_vm3, %v761_v59, %v764_v60  ;;  %v777_v6 = vsel %vm773_vm6, %v761_v59, %v776_v1  ;;  %v2333_v58 = vld [vmem:[#allocation12 + $0x8] sm:$0xff]  }
 0x33f   :  { %v778_v13 = vsel %vm772_vm5, %v775_v63, %v777_v6  ;;  %v782_v16 = vsel %vm772_vm5, %v779_v2, %v781_v9  ;;  %v786_v17 = vsel %vm772_vm5, %v783_v5, %v785_v12  ;;  %v2335_v2 = vld [vmem:[#allocation12 + $0x18] sm:$0xff]   ;;  %vm831_vm3 = vweird.f32 %v3203_v26 }
 0x340   :  { %v469_v21 = vadd.f32 %v1882_v18, %v461_v19  ;;  %v3211_v18 = vmul.u32.u64.low %v787_v57, %v786_v17  ;;  %v3212_v19 = vmul.u32.u64.high %v787_v57, %v786_v17, %v3211_v18 }
 0x342   :  { %v470_v22 = vmax.f32 %v469_v21, 0.0 }
 0x344   :  { %v471_v23 = vpack.c.bf16 %v470_v22, %v470_v22  ;;  %v3214_v21 = vmul.u32.u64.low %v787_v57, %v782_v16  ;;  %v3215_v22 = vmul.u32.u64.high %v787_v57, %v782_v16, %v3214_v21  ;;  %v2337_v16 = vld [vmem:[#allocation12 + $0x28] sm:$0xff]  }
 0x346   :  { %2076 = vmatmul.mubr.bf16.vlgmr.msra.gmra.mrb[0].mxu0 %v471_v23  ;;  %v794_v23 = vmul.u32 %v787_v57, %v778_v13  ;;  %vm796_vm7 = vc.u32 %v3212_v19, %v3214_v21  ;;  %v797_v24 = vadd.s32 1, %v3215_v22  ;;  %v795_v39 = vadd.s32 %v3214_v21, %v3212_v19  ;;  %v2332_v57 = vld [vmem:[#allocation12] sm:$0xff]   ;;  %v2338_v19 = vld [vmem:[#allocation12 + $0x30] sm:$0xff]  }
 0x347   :  { %2115 = vmatprep.mubr.msk.bf16.mxu0 %vm2860_vm1, %v2859_v54  ;;  %2100 = vmatpush3.bf16.msra.mxu0 %v2332_v57  ;;  %v1892_v57 = vld [vmem:[#allocation6] ss:$0 sm:$0xff] }
 0x348   :  { %v798_v25 = vsel %vm796_vm7, %v797_v24, %v3215_v22  ;;  %2101 = vmatprep.subr.bf16.mxu0 %v2859_v54 }
 0x349   :  { %v799_v27 = vadd.s32 %v798_v25, %v794_v23  ;;  %v2339_v23 = vld [vmem:[#allocation12 + $0x38] sm:$0xff]  }
 0x34b   :  { %v800_v28 = vadd.s32 536870912, %v799_v27  ;;  %2102 = vmatpush3.bf16.msra.mxu0 %v2333_v58 }
 0x34c   :  { %2103 = vmatprep.subr.bf16.mxu0 %v2859_v54 }
 0x34d   :  { %v801_v30 = vshrl.u32 %v800_v28, 30 }
 0x34f   :  { %v802_v31 = vshll.u32 %v801_v30, 30  ;;  %v825_v52 = vsub.s32 4, %v801_v30  ;;  %2104 = vmatpush3.bf16.msra.mxu0 %v2334_v61 }
 0x350   :  { %2105 = vmatprep.subr.bf16.mxu0 %v2859_v54 }
 0x351   :  { %v803_v32 = vsub.s32 %v799_v27, %v802_v31  ;;  %v826_v55 = vsel %vm741_vm9, %v825_v52, %v801_v30 }
 0x352   :  { %v828_v59 = vsel %vm740_vm10, 0, %v826_v55 }
 0x353   :  { %v805_v33 = vsub.s32 0, %v803_v32  ;;  %v832_v60 = vadd.s32 3, %v828_v59  ;;  %v936_v1 = vand.u32 3, %v828_v59  ;;  %2106 = vmatpush3.bf16.msra.mxu0 %v2335_v2  ;;  %v1893_v59 = vld [vmem:[#allocation7] ss:$0 sm:$0xff]  ;;  %v2353_v2 = vld [vmem:[#allocation15 + $0x28] sm:$0xff]  }
 0x354   :  { %2107 = vmatprep.subr.bf16.mxu0 %v2859_v54 }
 0x355   :  { %v1905_v34 = vmin.u32 %v805_v33, %v803_v32  ;;  %v833_v63 = vand.u32 3, %v832_v60  ;;  %vm938_vm13 = vcmp.eq.s32.totalorder %v936_v1, 0  ;;  %vm941_vm14 = vcmp.eq.s32.totalorder %v936_v1, 2  ;;  %v2340_v33 = vld [vmem:[#allocation9] sm:$0xff]  }
 0x356   :  { %vm937_vm2 = vcmp.lt.s32.totalorder %v936_v1, 2  ;;  %2080 = vmatpush3.bf16.msra.mxu1 %v2340_v33  ;;  %v2352_v1 = vld [vmem:[#allocation15 + $0x20] sm:$0xff]  }
 0x357   :  { %v807_v35 = vclz %v1905_v34  ;;  %vm835_vm11 = vcmp.eq.s32.totalorder %v833_v63, 0  ;;  %vm838_vm12 = vcmp.eq.s32.totalorder %v833_v63, 2  ;;  %vm834_vm15 = vcmp.lt.s32.totalorder %v833_v63, 2  ;;  %2108 = vmatpush3.bf16.msra.mxu0 %v2336_v7  ;;  %v2341_v34 = vld [vmem:[#allocation9 + $0x8] sm:$0xff]   ;;  %2081 = vmatprep.subr.bf16.mxu1 %v2859_v54  ;;  %v2351_v63 = vld [vmem:[#allocation15 + $0x18] sm:$0xff]  }
 0x358   :  { %2109 = vmatprep.subr.bf16.mxu0 %v2859_v54 }
 0x359   :  { %v1906_v36 = vadd.s32 4294967294, %v807_v35 }
 0x35a   :  { %2082 = vmatpush3.bf16.msra.mxu1 %v2341_v34 }
 0x35b   :  { %vm1907_vm8 = vcmp.lt.s32.totalorder %v1906_v36, 0  ;;  %2110 = vmatpush3.bf16.msra.mxu0 %v2337_v16  ;;  %2083 = vmatprep.subr.bf16.mxu1 %v2859_v54  ;;  %v2357_v16 = vld [vmem:[#allocation21] sm:$0xff]  }
 0x35c   :  { %v810_v37 = vsel %vm1907_vm8, 0, %v1906_v36  ;;  %2111 = vmatprep.subr.bf16.mxu0 %v2859_v54 }
 0x35d   :  { %v815_v38 = vsub.s32 4294967266, %v810_v37  ;;  %v811_v40 = vsub.s32 32, %v810_v37  ;;  %v812_v42 = vshll.u32 %v803_v32, %v810_v37 }
 0x35f   :  { %v816_v41 = vadd.s32 127, %v815_v38  ;;  %v813_v43 = vshrl.u32 %v795_v39, %v811_v40  ;;  %2112 = vmatpush3.bf16.msra.mxu0 %v2338_v19  ;;  %v2359_v19 = vld [vmem:[#allocation21 + $0x8] sm:$0xff]  }
 0x360   :  { %2113 = vmatprep.subr.bf16.mxu0 %v2859_v54 }
 0x361   :  { %v817_v44 = vshll.u32 %v816_v41, 23  ;;  %v814_v45 = vor.u32 %v813_v43, %v812_v42 }
 0x363   :  { %v818_v46 = vor.u32 4788187, %v817_v44  ;;  %v821_v48 = vcvt.s32.f32 %v814_v45  ;;  %2114 = vmatpush3.bf16.msra.mxu0 %v2339_v23  ;;  %v2342_v44 = vld [vmem:[#allocation9 + $0x10] sm:$0xff]   ;;  %v2343_v45 = vld [vmem:[#allocation9 + $0x18] sm:$0xff]  }
 0x364   :  { %2139 = vmatprep.subr.bf16.mxu0 %v2859_v54  ;;  %2084 = vmatpush3.bf16.msra.mxu1 %v2342_v44 }
 0x365   :  { %v819_v47 = vand.u32 2147483647, %v818_v46  ;;  %2085 = vmatprep.subr.bf16.mxu1 %v2859_v54  ;;  %v2344_v46 = vld [vmem:[#allocation9 + $0x20] sm:$0xff]  }
 0x367   :  { %v822_v49 = vmul.f32 %v821_v48, %v819_v47  ;;  %v2345_v47 = vld [vmem:[#allocation9 + $0x28] sm:$0xff]   ;;  %v2346_v48 = vld [vmem:[#allocation9 + $0x30] sm:$0xff]  }
 0x368   :  { %2086 = vmatpush3.bf16.msra.mxu1 %v2343_v45  ;;  %v2370_v45 = vld [vmem:[#allocation22 + $0x38] sm:$0xff]  }
 0x369   :  { %v823_v50 = vxor.u32 2147483648, %v822_v49  ;;  %2087 = vmatprep.subr.bf16.mxu1 %v2859_v54 }
 0x36b   :  { %v824_v51 = vsel %vm741_vm9, %v823_v50, %v822_v49  ;;  %v2347_v49 = vld [vmem:[#allocation9 + $0x38] sm:$0xff]  }
 0x36c   :  { %v827_v53 = vsel %vm740_vm10, %v3203_v26, %v824_v51  ;;  %v1883_v26 = vld [vmem:[#allocation4] ss:$0 sm:$0xff]  ;;  %2088 = vmatpush3.bf16.msra.mxu1 %v2344_v46  ;;  %v1174_v50 = vld [vmem:[%s3365_s24] sm:$0xff]  ;;  %v2371_v46 = vld [vmem:[#allocation21 + $0x38] sm:$0xff]  }
 0x36d   :  { %2398 = vcosq.f32 %v827_v53  ;;  %2089 = vmatprep.subr.bf16.mxu1 %v2859_v54 }
 0x36e   :  { %2400 = vsinq.f32 %v827_v53 }
 0x370   :  { %2090 = vmatpush3.bf16.msra.mxu1 %v2345_v47 }
 0x371   :  { %2091 = vmatprep.subr.bf16.mxu1 %v2859_v54 }
 0x374   :  { %2092 = vmatpush3.bf16.msra.mxu1 %v2346_v48 }
 0x375   :  { %2093 = vmatprep.subr.bf16.mxu1 %v2859_v54 }
 0x377   :  { %v2399_v62 = vpop.eup %2398 }
 0x378   :  { %v2401_v29 = vpop.eup %2400  ;;  %v839_v6 = vxor.u32 2147483648, %v2399_v62  ;;  %2094 = vmatpush3.bf16.msra.mxu1 %v2347_v49 }
 0x379   :  { %v836_v5 = vxor.u32 2147483648, %v2401_v29  ;;  %2119 = vmatprep.subr.bf16.mxu1 %v2859_v54 }
 0x37a   :  { %v840_v9 = vsel %vm838_vm12, %v839_v6, %v2401_v29  ;;  %v943_v13 = vsel %vm941_vm14, %v839_v6, %v2401_v29  ;;  %v2348_v29 = vld [vmem:[#allocation15] sm:$0xff]   ;;  %v2354_v6 = vld [vmem:[#allocation15 + $0x30] sm:$0xff]  }
 0x37b   :  { %v837_v8 = vsel %vm835_vm11, %v2399_v62, %v836_v5  ;;  %v940_v12 = vsel %vm938_vm13, %v2399_v62, %v836_v5  ;;  %v1912_v5 = vld [vmem:[#allocation13] ss:$0 sm:$0xff] }
 0x37c   :  { %v841_v17 = vsel %vm834_vm15, %v837_v8, %v840_v9  ;;  %v944_v18 = vsel %vm937_vm2, %v940_v12, %v943_v13  ;;  %v2355_v8 = vld [vmem:[#allocation15 + $0x38] sm:$0xff]   ;;  %v2356_v13 = vld [vmem:[#allocation22] sm:$0xff]  }
 0x37d   :  { %v842_v21 = vsel %vm831_vm3, nan, %v841_v17  ;;  %v945_v22 = vsel %vm831_vm3, nan, %v944_v18  ;;  %v2358_v18 = vld [vmem:[#allocation22 + $0x8] sm:$0xff]  }
 0x37e   :  { %v948_v24 = vsel %vm738_vm4, %v842_v21, %v945_v22  ;;  %v1175_v21 = vld [vmem:[#allocation18] sm:$0xf] }
 0x37f   :  { %v949_v25 = vpack.c.bf16 %v948_v24, %v948_v24  ;;  %v1192_v22 = vrot.slane %v1175_v21, %v366_v11  ;;  %v2360_v24 = vld [vmem:[#allocation22 + $0x10] sm:$0xff]   ;;  %v2363_v11 = vld [vmem:[#allocation21 + $0x18] sm:$0xff]   ;;  %v1212_v34 = vrot.slane %v1175_v21, %v386_v15 }
 0x381   :  { %2116 = vmatmul.mubr.bf16.vlgmr.msra.gmra.mrb[4].mxu0 %v949_v25  ;;  %v2361_v25 = vld [vmem:[#allocation21 + $0x10] sm:$0xff]  }
 0x382   :  { %2155 = vmatprep.mubr.msk.bf16.mxu0 %vm2860_vm1, %v2859_v54  ;;  %2140 = vmatpush3.bf16.msra.mxu0 %v2356_v13 }
 0x383   :  { %2141 = vmatprep.subr.bf16.mxu0 %v2859_v54 }
 0x386   :  { %2142 = vmatpush3.bf16.msra.mxu0 %v2358_v18 }
 0x387   :  { %2143 = vmatprep.subr.bf16.mxu0 %v2859_v54 }
 0x38a   :  { %2144 = vmatpush3.bf16.msra.mxu0 %v2360_v24 }
 0x38b   :  { %2145 = vmatprep.subr.bf16.mxu0 %v2859_v54 }
 0x419   :  { %v577_v27 = vpop.f32.mrb[0].mxu0 }
 0x41a   :  { %v578_v28 = vadd.f32 %v1883_v26, %v577_v27  ;;  %v2077_v30 = vpop.f32.mrb[1].mxu0  ;;  %v1202_v27 = vrot.slane %v1175_v21, %v376_v14 }
 0x41b   :  { %v580_v31 = vpop.f32.mrb[2].mxu0 }
 0x41c   :  { %583 = vadd.xlane.f32.xlu1 %v578_v28  ;;  %v2078_v32 = vpop.f32.mrb[3].mxu0 }
 0x41d   :  { %v2362_v32 = vld [vmem:[#allocation22 + $0x18] sm:$0xff]  }
 0x41e   :  { %2146 = vmatpush3.bf16.msra.mxu0 %v2362_v32 }
 0x41f   :  { %2147 = vmatprep.subr.bf16.mxu0 %v2859_v54 }
 0x454   :  { %v3239_v35 = vpop.f32.mrb[4].mxu0 }
 0x455   :  { %v2117_v36 = vpop.f32.mrb[5].mxu0  ;;  %v1056_v7 = vadd.f32 %v1912_v5, %v3239_v35  ;;  %v2364_v35 = vld [vmem:[#allocation22 + $0x20] sm:$0xff]  }
 0x456   :  { %v1058_v37 = vpop.f32.mrb[6].mxu0  ;;  %v2365_v36 = vld [vmem:[#allocation21 + $0x20] sm:$0xff]   ;;  %2148 = vmatpush3.bf16.msra.mxu0 %v2364_v35 }
 0x457   :  { %v2118_v38 = vpop.f32.mrb[7].mxu0  ;;  %v1061_v9 = vmax.f32 %v1056_v7, 0.0  ;;  %2149 = vmatprep.subr.bf16.mxu0 %v2859_v54  ;;  %v2383_v35 = vld [vmem:[%s3366_s0 + $0x18] sm:$0xff]  }
 0x458   :  { %v1222_v38 = vrot.slane %v1175_v21, %v396_v20  ;;  %v2369_v20 = vld [vmem:[#allocation21 + $0x30] sm:$0xff]  }
 0x459   :  { %v1062_v12 = vpack.c.bf16 %v1061_v9, %v1061_v9 }
 0x4a9   :  { %v584_v39 = vpop.xlane.xlu1 %583 }
 0x4aa   :  { %v585_v40 = vmul.f32 0.03125, %v584_v39 }
 0x4ac   :  { %v586_v41 = vsub.f32 %v578_v28, %v585_v40  ;;  %v1930_v28 = vld [vmem:[#allocation19] ss:$0 sm:$0xff]  ;;  %v2366_v40 = vld [vmem:[#allocation22 + $0x28] sm:$0xff]  }
 0x4ad   :  { %2150 = vmatpush3.bf16.msra.mxu0 %v2366_v40 }
 0x4ae   :  { %v587_v42 = vsel %vm347_vm0, %v586_v41, 0.0  ;;  %2151 = vmatprep.subr.bf16.mxu0 %v2859_v54 }
 0x4af   :  { %v588_v43 = vmul.f32 %v587_v42, %v587_v42 }
 0x4b1   :  { %589 = vadd.xlane.f32.xlu1 %v588_v43  ;;  %2152 = vmatpush3.bf16.msra.mxu0 %v2368_v10 }
 0x4b2   :  { %2153 = vmatprep.subr.bf16.mxu0 %v2859_v54 }
 0x4b5   :  { %2154 = vmatpush3.bf16.msra.mxu0 %v2370_v45 }
 0x4b6   :  { %2179 = vmatprep.subr.bf16.mxu0 %v2859_v54 }
 0x4c2   :  { %1186 = vperm.xlu1 %2319, %v1174_v50  }
 0x4c6   :  { %2320 = vset.pattern.permute.xlu1 %v2854_v4 }
 0x4c7   :  { %1196 = vperm.xlu1 %2320, %v1174_v50  }
 0x4cb   :  { %2321 = vset.pattern.permute.xlu1 %v2851_v0  ;;  %v2349_v0 = vld [vmem:[#allocation15 + $0x8] sm:$0xff]  }
 0x4cc   :  { %1206 = vperm.xlu1 %2321, %v1174_v50  }
 0x4d0   :  { %2322 = vset.pattern.permute.xlu1 %v2853_v3  ;;  %v2350_v3 = vld [vmem:[#allocation15 + $0x10] sm:$0xff]  }
 0x4d1   :  { %1216 = vperm.xlu1 %2322, %v1174_v50  }
 0x53e   :  { %v590_v51 = vpop.xlane.xlu1 %589 }
 0x53f   :  { %v591_v52 = vmul.f32 0.03125, %v590_v51 }
 0x541   :  { %v592_v53 = vadd.f32 1e-05, %v591_v52  ;;  %v1921_v52 = vld [vmem:[#allocation16] ss:$0 sm:$0xff] }
 0x542   :  { %v1187_v17 = vpop.permute.xlu1 %1186 }
 0x543   :  { %2402 = vrsqrt.f32 %v592_v53  ;;  %v1193_v26 = vmul.f32 %v1192_v22, %v1187_v17  ;;  %v1955_v22 = vld [vmem:[#allocation25] ss:$0 sm:$0xff] }
 0x545   :  { %v1194_v31 = vadd.f32 %v1930_v28, %v1193_v26  ;;  %v2380_v28 = vld [vmem:[%s3366_s0] sm:$0xff]  }
 0x546   :  { %v1197_v23 = vpop.permute.xlu1 %1196 }
 0x547   :  { %v1203_v33 = vmul.f32 %v1202_v27, %v1197_v23 }
 0x549   :  { %v1204_v14 = vadd.f32 %v1203_v33, %v1194_v31 }
 0x54b   :  { %v1207_v30 = vpop.permute.xlu1 %1206 }
 0x54c   :  { %v1213_v37 = vmul.f32 %v1212_v34, %v1207_v30  ;;  %v2381_v30 = vld [vmem:[%s3366_s0 + $0x8] sm:$0xff]  }
 0x54d   :  { %v2403_v55 = vpop.eup %2402 }
 0x54e   :  { %v594_v58 = vmul.f32 %v2403_v55, %v586_v41  ;;  %v1214_v15 = vadd.f32 %v1213_v37, %v1204_v14  ;;  %v2367_v41 = vld [vmem:[#allocation21 + $0x28] sm:$0xff]   ;;  %v2382_v14 = vld [vmem:[%s3366_s0 + $0x10] sm:$0xff]  }
 0x54f   :  { %v2385_v37 = vld [vmem:[%s3366_s0 + $0x28] sm:$0xff]  }
 0x550   :  { %v602_v60 = vmul.f32 %v1892_v57, %v594_v58  ;;  %v1217_v39 = vpop.permute.xlu1 %1216 }
 0x551   :  { %v1223_v42 = vmul.f32 %v1222_v38, %v1217_v39  ;;  %v2386_v38 = vld [vmem:[%s3366_s0 + $0x30] sm:$0xff]   ;;  %v2387_v39 = vld [vmem:[%s3366_s0 + $0x38] sm:$0xff]  }
 0x552   :  { %v610_v61 = vadd.f32 %v1893_v59, %v602_v60  ;;  %v2372_v59 = vld [vmem:[#allocation24] sm:$0xff]  }
 0x553   :  { %v1224_v43 = vadd.f32 %v1223_v42, %v1214_v15 }
 0x554   :  { %v611_v62 = vmax.f32 %v610_v61, 0.0 }
 0x555   :  { %v1225_v44 = vmax.f32 %v1224_v43, 0.0  ;;  %v1956_v43 = vld [vmem:[%s3367_s10] ss:$0 sm:$0xff] }
 0x556   :  { %v612_v4 = vpack.c.bf16 %v611_v62, %v611_v62  ;;  %v2373_v62 = vld [vmem:[#allocation24 + $0x8] sm:$0xff]  }
 0x557   :  { %v1226_v47 = vpack.c.bf16 %v1225_v44, %v1225_v44 }
 0x558   :  { %2096 = vmatmul.mubr.bf16.vlgmr.msra.gmra.mrb[0].mxu1 %v612_v4  ;;  %v2375_v4 = vld [vmem:[#allocation24 + $0x18] sm:$0xff]  }
 0x559   :  { %2120 = vmatpush3.bf16.msra.mxu1 %v2348_v29  ;;  %2135 = vmatprep.mubr.msk.bf16.mxu1 %vm2860_vm1, %v2859_v54  ;;  %v2374_v29 = vld [vmem:[#allocation24 + $0x10] sm:$0xff]  }
 0x55a   :  { %2121 = vmatprep.subr.bf16.mxu1 %v2859_v54 }
 0x55d   :  { %2122 = vmatpush3.bf16.msra.mxu1 %v2349_v0  ;;  %v2376_v0 = vld [vmem:[#allocation24 + $0x20] sm:$0xff]  }
 0x55e   :  { %2123 = vmatprep.subr.bf16.mxu1 %v2859_v54 }
 0x561   :  { %2124 = vmatpush3.bf16.msra.mxu1 %v2350_v3  ;;  %v2377_v3 = vld [vmem:[#allocation24 + $0x28] sm:$0xff]  }
 0x562   :  { %2125 = vmatprep.subr.bf16.mxu1 %v2859_v54 }
 0x565   :  { %2126 = vmatpush3.bf16.msra.mxu1 %v2351_v63  ;;  %v2378_v63 = vld [vmem:[#allocation24 + $0x30] sm:$0xff]  }
 0x566   :  { %2127 = vmatprep.subr.bf16.mxu1 %v2859_v54 }
 0x569   :  { %2128 = vmatpush3.bf16.msra.mxu1 %v2352_v1  ;;  %v1894_v1 = vld [vmem:[#allocation10] ss:$0 sm:$0xff] }
 0x56a   :  { %2129 = vmatprep.subr.bf16.mxu1 %v2859_v54 }
 0x56d   :  { %2130 = vmatpush3.bf16.msra.mxu1 %v2353_v2  ;;  %v2379_v2 = vld [vmem:[#allocation24 + $0x38] sm:$0xff]  }
 0x56e   :  { %2131 = vmatprep.subr.bf16.mxu1 %v2859_v54 }
 0x571   :  { %2132 = vmatpush3.bf16.msra.mxu1 %v2354_v6 }
 0x572   :  { %2133 = vmatprep.subr.bf16.mxu1 %v2859_v54 }
 0x575   :  { %2134 = vmatpush3.bf16.msra.mxu1 %v2355_v8 }
 0x576   :  { %2159 = vmatprep.subr.bf16.mxu1 %v2859_v54 }
 0x578   :  { %2136 = vmatmul.mubr.bf16.vlgmr.msra.gmra.mrb[4].mxu1 %v1062_v12 }
 0x579   :  { %2175 = vmatprep.mubr.msk.bf16.mxu1 %vm2860_vm1, %v2859_v54  ;;  %2160 = vmatpush3.bf16.msra.mxu1 %v2357_v16 }
 0x57a   :  { %2161 = vmatprep.subr.bf16.mxu1 %v2859_v54 }
 0x57d   :  { %2162 = vmatpush3.bf16.msra.mxu1 %v2359_v19 }
 0x57e   :  { %2163 = vmatprep.subr.bf16.mxu1 %v2859_v54 }
 0x581   :  { %2164 = vmatpush3.bf16.msra.mxu1 %v2361_v25 }
 0x582   :  { %2165 = vmatprep.subr.bf16.mxu1 %v2859_v54 }
 0x585   :  { %2166 = vmatpush3.bf16.msra.mxu1 %v2363_v11 }
 0x586   :  { %2167 = vmatprep.subr.bf16.mxu1 %v2859_v54 }
 0x589   :  { %2168 = vmatpush3.bf16.msra.mxu1 %v2365_v36  ;;  %v2384_v36 = vld [vmem:[%s3366_s0 + $0x20] sm:$0xff]  }
 0x58a   :  { %2169 = vmatprep.subr.bf16.mxu1 %v2859_v54 }
 0x58d   :  { %2170 = vmatpush3.bf16.msra.mxu1 %v2367_v41 }
 0x58e   :  { %2171 = vmatprep.subr.bf16.mxu1 %v2859_v54 }
 0x591   :  { %2172 = vmatpush3.bf16.msra.mxu1 %v2369_v20  ;;  %v1957_v20 = vld [vmem:[%s3368_s6] ss:$0 sm:$0xff] }
 0x592   :  { %2173 = vmatprep.subr.bf16.mxu1 %v2859_v54 }
 0x595   :  { %2174 = vmatpush3.bf16.msra.mxu1 %v2371_v46 }
 0x596   :  { %2199 = vmatprep.subr.bf16.mxu1 %v2859_v54 }
 0x598   :  { %2176 = vmatmul.mubr.bf16.vlgmr.msra.gmra.mrb[8].mxu1 %v1226_v47 }
 0x599   :  { %2215 = vmatprep.mubr.msk.bf16.mxu1 %vm2860_vm1, %v2859_v54  ;;  %2200 = vmatpush3.bf16.msra.mxu1 %v2380_v28 }
 0x59a   :  { %2201 = vmatprep.subr.bf16.mxu1 %v2859_v54 }
 0x59d   :  { %2202 = vmatpush3.bf16.msra.mxu1 %v2381_v30 }
 0x59e   :  { %2203 = vmatprep.subr.bf16.mxu1 %v2859_v54 }
 0x5a1   :  { %2204 = vmatpush3.bf16.msra.mxu1 %v2382_v14 }
 0x5a2   :  { %2205 = vmatprep.subr.bf16.mxu1 %v2859_v54 }
 0x5a5   :  { %2206 = vmatpush3.bf16.msra.mxu1 %v2383_v35 }
 0x5a6   :  { %2207 = vmatprep.subr.bf16.mxu1 %v2859_v54 }
 0x5a9   :  { %2208 = vmatpush3.bf16.msra.mxu1 %v2384_v36 }
 0x5aa   :  { %2209 = vmatprep.subr.bf16.mxu1 %v2859_v54 }
 0x5ad   :  { %2210 = vmatpush3.bf16.msra.mxu1 %v2385_v37 }
 0x5ae   :  { %2211 = vmatprep.subr.bf16.mxu1 %v2859_v54 }
 0x5b1   :  { %2212 = vmatpush3.bf16.msra.mxu1 %v2386_v38 }
 0x5b2   :  { %2213 = vmatprep.subr.bf16.mxu1 %v2859_v54 }
 0x5b5   :  { %2214 = vmatpush3.bf16.msra.mxu1 %v2387_v39 }
 0x62b   :  { %v718_v48 = vpop.f32.mrb[0].mxu1 }
 0x62c   :  { %v2097_v49 = vpop.f32.mrb[1].mxu1  ;;  %v719_v5 = vadd.f32 %v1894_v1, %v718_v48  ;;  %v1958_v48 = vld [vmem:[%s3369_s29] ss:$0 sm:$0xff] }
 0x62d   :  { %v721_v50 = vpop.f32.mrb[2].mxu1 }
 0x62e   :  { %v2098_v51 = vpop.f32.mrb[3].mxu1  ;;  %v1436_v6 = vpack.c.bf16 %v719_v5, %v719_v5 }
 0x64b   :  { %v1168_v53 = vpop.f32.mrb[4].mxu1 }
 0x64c   :  { %v1169_v55 = vadd.f32 %v1921_v52, %v1168_v53  ;;  %v2137_v57 = vpop.f32.mrb[5].mxu1 }
 0x64d   :  { %v1171_v58 = vpop.f32.mrb[6].mxu1  ;;  %v2389_v57 = vld [vmem:[#allocation27 + $0x8] sm:$0xff]  }
 0x64e   :  { %v1243_v60 = vpack.c.bf16 %v1169_v55, %v1169_v55  ;;  %v2138_v61 = vpop.f32.mrb[7].mxu1  ;;  %v2388_v55 = vld [vmem:[#allocation27] sm:$0xff]  }
 0x650   :  { %2156 = vmatmul.mubr.bf16.vlgmr.msra.gmra.mrb[8].mxu0 %v1243_v60 }
 0x651   :  { %2180 = vmatpush3.bf16.msra.mxu0 %v2372_v59  ;;  %2195 = vmatprep.mubr.msk.bf16.mxu0 %vm2860_vm1, %v2859_v54 }
 0x652   :  { %2181 = vmatprep.subr.bf16.mxu0 %v2859_v54 }
 0x655   :  { %2182 = vmatpush3.bf16.msra.mxu0 %v2373_v62 }
 0x656   :  { %2183 = vmatprep.subr.bf16.mxu0 %v2859_v54 }
 0x659   :  { %2184 = vmatpush3.bf16.msra.mxu0 %v2374_v29  ;;  %v2390_v29 = vld [vmem:[#allocation27 + $0x10] sm:$0xff]  }
 0x65a   :  { %2185 = vmatprep.subr.bf16.mxu0 %v2859_v54 }
 0x65d   :  { %2186 = vmatpush3.bf16.msra.mxu0 %v2375_v4  ;;  %v2391_v4 = vld [vmem:[#allocation27 + $0x18] sm:$0xff]  }
 0x65e   :  { %2187 = vmatprep.subr.bf16.mxu0 %v2859_v54 }
 0x661   :  { %2188 = vmatpush3.bf16.msra.mxu0 %v2376_v0  ;;  %v2392_v0 = vld [vmem:[#allocation27 + $0x20] sm:$0xff]  }
 0x662   :  { %2189 = vmatprep.subr.bf16.mxu0 %v2859_v54 }
 0x665   :  { %2190 = vmatpush3.bf16.msra.mxu0 %v2377_v3  ;;  %v2393_v3 = vld [vmem:[#allocation27 + $0x28] sm:$0xff]  }
 0x666   :  { %2191 = vmatprep.subr.bf16.mxu0 %v2859_v54 }
 0x669   :  { %2192 = vmatpush3.bf16.msra.mxu0 %v2378_v63  ;;  %v2395_v63 = vld [vmem:[#allocation27 + $0x38] sm:$0xff]  }
 0x66a   :  { %2193 = vmatprep.subr.bf16.mxu0 %v2859_v54 }
 0x66b   :  { %v1430_v7 = vpop.f32.mrb[8].mxu1 }
 0x66c   :  { %v2177_v8 = vpop.f32.mrb[9].mxu1 }
 0x66d   :  { %2194 = vmatpush3.bf16.msra.mxu0 %v2379_v2  ;;  %v1433_v9 = vpop.f32.mrb[10].mxu1 }
 0x66e   :  { %2219 = vmatprep.subr.bf16.mxu0 %v2859_v54  ;;  %v2178_v12 = vpop.f32.mrb[11].mxu1  ;;  %v1968_v9 = vld [vmem:[%s3020_s13] ss:$0 sm:$0xff] }
 0x670   :  { %2196 = vmatmul.mubr.bf16.vlgmr.msra.gmra.mrb[12].mxu0 %v1436_v6 }
 0x671   :  { %2235 = vmatprep.mubr.msk.bf16.mxu0 %vm2860_vm1, %v2859_v54  ;;  %vm348_vm1 = vcmp.lt.s32.totalorder %v3177_v56, 64  ;;  %2220 = vmatpush3.bf16.msra.mxu0 %v2388_v55  ;;  %v2394_v56 = vld [vmem:[#allocation27 + $0x30] sm:$0xff]  }
 0x672   :  { %2221 = vmatprep.subr.bf16.mxu0 %v2859_v54 }
 0x675   :  { %2222 = vmatpush3.bf16.msra.mxu0 %v2389_v57 }
 0x676   :  { %2223 = vmatprep.subr.bf16.mxu0 %v2859_v54 }
 0x679   :  { %2224 = vmatpush3.bf16.msra.mxu0 %v2390_v29 }
 0x67a   :  { %2225 = vmatprep.subr.bf16.mxu0 %v2859_v54 }
 0x67d   :  { %2226 = vmatpush3.bf16.msra.mxu0 %v2391_v4 }
 0x67e   :  { %2227 = vmatprep.subr.bf16.mxu0 %v2859_v54 }
 0x681   :  { %2228 = vmatpush3.bf16.msra.mxu0 %v2392_v0 }
 0x682   :  { %2229 = vmatprep.subr.bf16.mxu0 %v2859_v54 }
 0x685   :  { %2230 = vmatpush3.bf16.msra.mxu0 %v2393_v3 }
 0x686   :  { %2231 = vmatprep.subr.bf16.mxu0 %v2859_v54 }
 0x689   :  { %2232 = vmatpush3.bf16.msra.mxu0 %v2394_v56 }
 0x68a   :  { %2233 = vmatprep.subr.bf16.mxu0 %v2859_v54 }
 0x68d   :  { %2234 = vmatpush3.bf16.msra.mxu0 %v2395_v63 }
 0x723   :  { %v1342_v13 = vpop.f32.mrb[8].mxu0 }
 0x724   :  { %v1431_v16 = vadd.f32 %v1430_v7, %v1342_v13  ;;  %v2157_v17 = vpop.f32.mrb[9].mxu0  ;;  %v1967_v7 = vld [vmem:[%s3370_s12] ss:$0 sm:$0xff] }
 0x725   :  { %v1345_v18 = vpop.f32.mrb[10].mxu0 }
 0x726   :  { %v2158_v19 = vpop.f32.mrb[11].mxu0  ;;  %v1969_v18 = vld [vmem:[%s3030_s3] ss:$0 sm:$0xff] }
 0x743   :  { %v1535_v21 = vpop.f32.mrb[12].mxu0 }
 0x744   :  { %v1541_v23 = vadd.f32 %v1535_v21, %v1431_v16  ;;  %v2197_v24 = vpop.f32.mrb[13].mxu0 }
 0x745   :  { %v1538_v25 = vpop.f32.mrb[14].mxu0 }
 0x746   :  { %v2198_v26 = vpop.f32.mrb[15].mxu0  ;;  %v1549_v27 = vadd.f32 %v1955_v22, %v1541_v23 }
 0x748   :  { %1550 = vadd.xlane.f32.xlu1 %v1549_v27 }
 0x7d5   :  { %v1551_v31 = vpop.xlane.xlu1 %1550 }
 0x7d6   :  { %v1552_v32 = vmul.f32 0.015625, %v1551_v31 }
 0x7d8   :  { %v1553_v11 = vsub.f32 %v1549_v27, %v1552_v32 }
 0x7da   :  { %v1556_v33 = vsel %vm348_vm1, %v1553_v11, 0.0 }
 0x7db   :  { %v1557_v34 = vmul.f32 %v1556_v33, %v1556_v33 }
 0x7dd   :  { %1558 = vadd.xlane.f32.xlu0 %v1557_v34 }
 0x86a   :  { %v1559_v15 = vpop.xlane.xlu0 %1558 }
 0x86b   :  { %v1560_v40 = vmul.f32 0.015625, %v1559_v15 }
 0x86d   :  { %v1561_v41 = vadd.f32 1e-05, %v1560_v40 }
 0x86f   :  { %2404 = vrsqrt.f32 %v1561_v41 }
 0x879   :  { %v2405_v42 = vpop.eup %2404 }
 0x87a   :  { %v1563_v10 = vmul.f32 %v2405_v42, %v1553_v11 }
 0x87c   :  { %v1571_v44 = vmul.f32 %v1956_v43, %v1563_v10 }
 0x87e   :  { %v1579_v45 = vadd.f32 %v1957_v20, %v1571_v44 }
 0x880   :  { %v1580_v46 = vmax.f32 %v1579_v45, 0.0 }
 0x882   :  { %v1581_v47 = vpack.c.bf16 %v1580_v46, %v1580_v46 }
 0x884   :  { %2216 = vmatmul.mubr.bf16.vlgmr.msra.gmra.mrb[12].mxu1 %v1581_v47 }
 0x957   :  { %v1687_v49 = vpop.f32.mrb[12].mxu1 }
 0x958   :  { %v1688_v50 = vadd.f32 %v1958_v48, %v1687_v49  ;;  %v2217_v51 = vpop.f32.mrb[13].mxu1 }
 0x959   :  { %v1690_v52 = vpop.f32.mrb[14].mxu1 }
 0x95a   :  { %1693 = vadd.xlane.f32.xlu0 %v1688_v50  ;;  %v2218_v53 = vpop.f32.mrb[15].mxu1 }
 0x9e7   :  { %v1694_v58 = vpop.xlane.xlu0 %1693 }
 0x9e8   :  { %v1695_v59 = vmul.f32 0.03125, %v1694_v58 }
 0x9ea   :  { %v1696_v60 = vsub.f32 %v1688_v50, %v1695_v59 }
 0x9ec   :  { %v1697_v61 = vsel %vm347_vm0, %v1696_v60, 0.0 }
 0x9ed   :  { %v1698_v62 = vmul.f32 %v1697_v61, %v1697_v61 }
 0x9ef   :  { %1699 = vadd.xlane.f32.xlu1 %v1698_v62 }
 0xa7c   :  { %v1700_v1 = vpop.xlane.xlu1 %1699 }
 0xa7d   :  { %v1701_v2 = vmul.f32 0.03125, %v1700_v1 }
 0xa7f   :  { %v1702_v5 = vadd.f32 1e-05, %v1701_v2 }
 0xa81   :  { %2406 = vrsqrt.f32 %v1702_v5 }
 0xa8b   :  { %v2407_v6 = vpop.eup %2406 }
 0xa8c   :  { %v1704_v8 = vmul.f32 %v2407_v6, %v1696_v60 }
 0xa8e   :  { %v1712_v12 = vmul.f32 %v1967_v7, %v1704_v8 }
 0xa90   :  { %v1720_v13 = vadd.f32 %v1968_v9, %v1712_v12 }
 0xa92   :  { %v1721_v16 = vmax.f32 %v1720_v13, 0.0 }
 0xa94   :  { %v1722_v17 = vpack.c.bf16 %v1721_v16, %v1721_v16 }
 0xa96   :  { %2236 = vmatmul.mubr.bf16.vlgmr.msra.gmra.mrb[16].mxu0 %v1722_v17 }
 0xb69   :  { %v1828_v19 = vpop.f32.mrb[16].mxu0 }
 0xb6a   :  { %v1829_v21 = vadd.f32 %v1969_v18, %v1828_v19  ;;  %v2237_v22 = vpop.f32.mrb[17].mxu0 }
 0xb6b   :  { %v1831_v54 = vpop.f32.mrb[18].mxu0 }
 0xb6c   :  { %1834 = vst [vmem:[%s3035_s25] sm:$0xff] %v1829_v21  ;;  %v2238_v23 = vpop.f32.mrb[19].mxu0 }
 0xb6d   :  { %1839 = vsyncpa [#allocation3], 1 }
 0xb6e   :  { %1840 = vsyncpa [#allocation5], 1 }
 0xb6f   :  { %1841 = vsyncpa [#allocation8], 1 }
 0xb70   :  { %1842 = vsyncpa [#allocation11], 1 }
 0xb71   :  { %1843 = vsyncpa [#allocation14], 1 }
 0xb72   :  { %1844 = vsyncpa [#allocation17], 1 }
 0xb73   :  { %1845 = vsyncpa [#allocation20], 1 }
 0xb74   :  { %1846 = vsyncpa [#allocation23], 1 }
 0xb75   :  { %1847 = vsyncpa [#allocation26], 1 }

</bundles_post_ra>
